<compile_context>
chip_gen: v6e
topology: v6e:2x2x1
jax: 0.10.0
libtpu: 0.0.40
codegen_flags: <defaults>
</compile_context>

<pallas_src>
import numpy as np
import jax
import jax.numpy as jnp
from jax import lax
from jax.experimental import pallas as pl
from jax.experimental.pallas import tpu as pltpu


# ----------------------------- Pallas kernels ------------------------------

def _conv_pool_tile(x_ref, w1_ref, b1_ref, w2_ref, b2_ref, w3_ref, acc_ref):
    """One point-tile of the conv stack; folds the RAW layer-3 output into acc.

    acc_ref is an (8, 1024) f32 VMEM scratch holding a sublane-dense partial
    max over points.  Layer-3 bias + ReLU are deferred (commute with max).
    """
    n = pl.program_id(1)

    # -inf init is safe: every point tile updates all 1024 channels, so acc is
    # finite before it is read (deferred bias/ReLU happens after the max).
    @pl.when(n == 0)
    def _():
        acc_ref[...] = jnp.full(acc_ref.shape, -jnp.inf, dtype=acc_ref.dtype)

    cdt = w1_ref.dtype                                           # compute dtype
    xt = x_ref[0]                                                # (k, tile_n)

    # Layer 1: contract over k -- transposed LHS feeds the MXU directly.
    # TODO(synk): K=k (3/4) underfills the MXU; could be k VPU FMAs if this
    # ever shows up exposed in a profile (low priority, ~0.2% of FLOPs).
    h = lax.dot_general(xt.astype(cdt), w1_ref[...],
                        (((0,), (0,)), ((), ())),
                        preferred_element_type=jnp.float32)
    h = jnp.maximum(h + b1_ref[...], 0.0)                        # (tile_n, 64)
    h = jnp.dot(h.astype(cdt), w2_ref[...], preferred_element_type=jnp.float32)
    h = jnp.maximum(h + b2_ref[...], 0.0)                        # (tile_n, 128)
    # Layer 3: bias + ReLU deferred past the max pool.
    h = jnp.dot(h.astype(cdt), w3_ref[...], preferred_element_type=jnp.float32)

    tn, c3 = h.shape
    h8 = jnp.max(h.reshape(tn // 8, 8, c3), axis=0)              # (8, 1024)
    acc_ref[...] = jnp.maximum(acc_ref[...], h8)


def _stn_fused_kernel(x_ref,
                      w1_ref, b1_ref, w2_ref, b2_ref, w3_ref, b3_ref,
                      fw1_ref, b4_ref, fw2_ref, b5_ref, fw3_ref, b6_ref,
                      out_ref, acc_ref):
    """Conv stack + point max-pool + fused FC tail.  Grid = (batch, point_tiles)."""
    _conv_pool_tile(x_ref, w1_ref, b1_ref, w2_ref, b2_ref, w3_ref, acc_ref)

    @pl.when(pl.program_id(1) == pl.num_programs(1) - 1)
    def _():
        cdt = w1_ref.dtype
        pooled = jnp.max(acc_ref[...], axis=0, keepdims=True)    # (1, 1024)
        pooled = jnp.maximum(pooled + b3_ref[...], 0.0)          # deferred bias+ReLU
        f = jnp.dot(pooled.astype(cdt), fw1_ref[...],
                    preferred_element_type=jnp.float32)
        f = jnp.maximum(f + b4_ref[...], 0.0)                    # (1, 512)
        f = jnp.dot(f.astype(cdt), fw2_ref[...],
                    preferred_element_type=jnp.float32)
        f = jnp.maximum(f + b5_ref[...], 0.0)                    # (1, 256)
        y = jnp.dot(f.astype(cdt), fw3_ref[...],
                    preferred_element_type=jnp.float32)
        out_ref[0] = (y + b6_ref[...]).astype(out_ref.dtype)     # (1, k*k)


def _stn_pool_kernel(x_ref,
                     w1_ref, b1_ref, w2_ref, b2_ref, w3_ref,
                     pooled_ref, acc_ref):
    """Conv stack + point max-pool only; emits the raw pooled (1, 1024) slab."""
    _conv_pool_tile(x_ref, w1_ref, b1_ref, w2_ref, b2_ref, w3_ref, acc_ref)

    @pl.when(pl.program_id(1) == pl.num_programs(1) - 1)
    def _():
        pooled_ref[0] = jnp.max(acc_ref[...], axis=0, keepdims=True)  # (1, 1024)


# ------------------------------ JAX wrapper --------------------------------

def _bn_scale_shift(gamma, beta, mean, var, lin_bias, eps=1e-5):
    """Eval-mode BatchNorm folded with the preceding layer's bias."""
    s = gamma / jnp.sqrt(var + eps)
    b = beta + (lin_bias - mean) * s
    return s.astype(jnp.float32), b.astype(jnp.float32)


def _tpu_vmem_budget():
    """(vmem_limit_bytes, tile_n cap) -- generation aware, conservative fallback."""
    try:
        vmem = pltpu.get_tpu_info().vmem_capacity_bytes
    except Exception:
        vmem = 64 * 1024 * 1024
    if vmem >= 128 * 1024 * 1024:            # v5e / v6e: 128 MiB VMEM
        return 48 * 1024 * 1024, 4096
    return 32 * 1024 * 1024, 2048            # v7x: 64 MiB per TensorCore


def spatial_transformer_forward(x, params, *, tile_n=None,
                                compute_dtype=jnp.bfloat16, fuse_fc=None):
    """x: (B, k, N) float32 (PyTorch layout). Returns (B, k, k)."""
    B, k, N = x.shape
    vmem_limit, tile_cap = _tpu_vmem_budget()
    if tile_n is None:
        tile_n = N if N <= tile_cap else tile_cap
    assert N % tile_n == 0, "N must be a multiple of tile_n"
    assert tile_n % 8 == 0, "tile_n must be a multiple of 8"
    assert tile_n % 128 == 0 or tile_n == N, "tile_n must be lane-aligned or full"
    n_tiles = N // tile_n
    if fuse_fc is None:
        # Keep the FC tail fused only when the per-batch conv grid is long and
        # B is small; otherwise hoist it so the three M=1 matmuls run at M=B.
        fuse_fc = (B < 8) and (n_tiles > 2)

    x = x.astype(jnp.float32)

    # Fold BN into scale/shift (f32 masters), then fold the scale into weights.
    s1, b1 = _bn_scale_shift(params['g1'], params['bt1'], params['m1'], params['v1'], params['cb1'])
    s2, b2 = _bn_scale_shift(params['g2'], params['bt2'], params['m2'], params['v2'], params['cb2'])
    s3, b3 = _bn_scale_shift(params['g3'], params['bt3'], params['m3'], params['v3'], params['cb3'])
    s4, b4 = _bn_scale_shift(params['g4'], params['bt4'], params['m4'], params['v4'], params['fb1'])
    s5, b5 = _bn_scale_shift(params['g5'], params['bt5'], params['m5'], params['v5'], params['fb2'])

    w1 = params['cw1'] * s1[None, :]                              # (k, 64)
    w2 = params['cw2'] * s2[None, :]                              # (64, 128)
    w3 = params['cw3'] * s3[None, :]                              # (128, 1024)
    fw1 = params['fw1'] * s4[None, :]                             # (1024, 512)
    fw2 = params['fw2'] * s5[None, :]                             # (512, 256)
    fw3 = params['fw3'].astype(jnp.float32)                       # (256, k*k)
    # fc3 bias + identity offset merged into one constant.
    b6 = params['fb3'].astype(jnp.float32) + jnp.eye(k, dtype=jnp.float32).reshape(-1)

    cd = compute_dtype
    conv_ops = (w1.astype(cd), b1.reshape(1, -1),
                w2.astype(cd), b2.reshape(1, -1),
                w3.astype(cd))

    def const_spec(a):
        return pl.BlockSpec(a.shape, lambda bi, ni, nd=a.ndim: (0,) * nd)

    x_spec = pl.BlockSpec((1, k, tile_n), lambda bi, ni: (bi, 0, ni))
    cparams = pltpu.CompilerParams(
        dimension_semantics=("parallel", "arbitrary"),
        vmem_limit_bytes=vmem_limit)
    scratch = [pltpu.VMEM((8, 1024), jnp.float32)]

    if fuse_fc:
        ops = conv_ops + (b3.reshape(1, -1),
                          fw1.astype(cd), b4.reshape(1, -1),
                          fw2.astype(cd), b5.reshape(1, -1),
                          fw3.astype(cd), b6.reshape(1, k * k))
        out = pl.pallas_call(
            _stn_fused_kernel,
            out_shape=jax.ShapeDtypeStruct((B, 1, k * k), jnp.float32),
            grid=(B, n_tiles),
            in_specs=[x_spec] + [const_spec(a) for a in ops],
            out_specs=pl.BlockSpec((1, 1, k * k), lambda bi, ni: (bi, 0, 0)),
            scratch_shapes=scratch,
            compiler_params=cparams,
        )(x, *ops)
        return out.reshape(B, k, k)

    # Hoisted-FC path: kernel emits the raw pooled (B, 1, 1024) lane-dense slab.
    pooled = pl.pallas_call(
        _stn_pool_kernel,
        out_shape=jax.ShapeDtypeStruct((B, 1, 1024), jnp.float32),
        grid=(B, n_tiles),
        in_specs=[x_spec] + [const_spec(a) for a in conv_ops],
        out_specs=pl.BlockSpec((1, 1, 1024), lambda bi, ni: (bi, 0, 0)),
        scratch_shapes=scratch,
        compiler_params=cparams,
    )(x, *conv_ops)

    # Deferred layer-3 bias + ReLU, then the tiny FC stack once at M=B (f32 XLA).
    p = jnp.maximum(pooled.reshape(B, 1024) + b3[None, :], 0.0)
    f = jnp.maximum(p @ fw1 + b4[None, :], 0.0)
    f = jnp.maximum(f @ fw2 + b5[None, :], 0.0)
    y = f @ fw3 + b6[None, :]
    return y.reshape(B, k, k)


# ------------------------- Pure-JAX reference ------------------------------

def ref_forward(x, params, eps=1e-5):
    B, k, N = x.shape
    h = jnp.transpose(x, (0, 2, 1)).astype(jnp.float32)

    def cbr(h, w, cb, g, bt, m, v):
        y = jnp.einsum('bnc,cd->bnd', h, w) + cb
        y = (y - m) / jnp.sqrt(v + eps) * g + bt
        return jnp.maximum(y, 0.0)

    h = cbr(h, params['cw1'], params['cb1'], params['g1'], params['bt1'], params['m1'], params['v1'])
    h = cbr(h, params['cw2'], params['cb2'], params['g2'], params['bt2'], params['m2'], params['v2'])
    h = cbr(h, params['cw3'], params['cb3'], params['g3'], params['bt3'], params['m3'], params['v3'])
    f = jnp.max(h, axis=1)                                        # (B, 1024)

    def lbr(f, w, fb, g, bt, m, v):
        y = f @ w + fb
        y = (y - m) / jnp.sqrt(v + eps) * g + bt
        return jnp.maximum(y, 0.0)

    f = lbr(f, params['fw1'], params['fb1'], params['g4'], params['bt4'], params['m4'], params['v4'])
    f = lbr(f, params['fw2'], params['fb2'], params['g5'], params['bt5'], params['m5'], params['v5'])
    y = f @ params['fw3'] + params['fb3']
    y = y + jnp.eye(k, dtype=jnp.float32).reshape(1, k * k)
    return y.reshape(B, k, k)


# ---------------------- Deterministic parameter init -----------------------

def init_params(key, k):
    dims_conv = [(k, 64), (64, 128), (128, 1024)]
    dims_fc = [(1024, 512), (512, 256), (256, k * k)]
    keys = iter(jax.random.split(key, 64))
    params = {}

    def nrm(shape, scale):
        return (scale * jax.random.normal(next(keys), shape)).astype(jnp.float32)

    for i, (ci, co) in enumerate(dims_conv, start=1):
        params[f'cw{i}'] = nrm((ci, co), 1.0 / np.sqrt(ci))
        params[f'cb{i}'] = nrm((co,), 0.05)
        params[f'g{i}'] = 1.0 + nrm((co,), 0.1)
        params[f'bt{i}'] = nrm((co,), 0.05)
        params[f'm{i}'] = nrm((co,), 0.02)
        params[f'v{i}'] = 1.0 + 0.1 * jnp.abs(jax.random.normal(next(keys), (co,)).astype(jnp.float32))

    for i, (ci, co) in enumerate(dims_fc, start=1):
        params[f'fw{i}'] = nrm((ci, co), 1.0 / np.sqrt(ci))
        params[f'fb{i}'] = nrm((co,), 0.05)

    for j, co in zip((4, 5), (512, 256)):
        params[f'g{j}'] = 1.0 + nrm((co,), 0.1)
        params[f'bt{j}'] = nrm((co,), 0.05)
        params[f'm{j}'] = nrm((co,), 0.02)
        params[f'v{j}'] = 1.0 + 0.1 * jnp.abs(jax.random.normal(next(keys), (co,)).astype(jnp.float32))

    return params


# --------------------------------- Main -------------------------------------

if __name__ == "__main__":
    key = jax.random.PRNGKey(0)
    kx, kp = jax.random.split(key)

    B, k, N = 2, 4, 256          # (batch, features, num_points)
    x = jax.random.normal(kx, (B, k, N), dtype=jnp.float32)
    params = init_params(kp, k)

    ref = ref_forward(x, params)

    # Default path: bf16 matmuls, FC tail hoisted (N/tile_n is small here).
    out = jax.block_until_ready(spatial_transformer_forward(x, params))
    assert out.shape == (B, k, k)
    np.testing.assert_allclose(np.asarray(out), np.asarray(ref), rtol=5e-2, atol=5e-2)

    # f32 compute, fused in-kernel FC tail: tight match against the reference.
    out_f32_fused = jax.block_until_ready(
        spatial_transformer_forward(x, params, compute_dtype=jnp.float32, fuse_fc=True))
    np.testing.assert_allclose(np.asarray(out_f32_fused), np.asarray(ref),
                               rtol=2e-3, atol=2e-3)

    # f32 compute, hoisted FC tail: tight match.
    out_f32_hoist = jax.block_until_ready(
        spatial_transformer_forward(x, params, compute_dtype=jnp.float32, fuse_fc=False))
    np.testing.assert_allclose(np.asarray(out_f32_hoist), np.asarray(ref),
                               rtol=2e-3, atol=2e-3)

    # bf16 compute, fused in-kernel FC tail: loose match (~1% bf16 error).
    out_bf16_fused = jax.block_until_ready(
        spatial_transformer_forward(x, params, compute_dtype=jnp.bfloat16, fuse_fc=True))
    np.testing.assert_allclose(np.asarray(out_bf16_fused), np.asarray(ref),
                               rtol=5e-2, atol=5e-2)

    print("KERNEL_OK")
</pallas_src>

<mosaic_0001>
module attributes {stable_mosaic.version = 11 : i64} {
  func.func @_stn_pool_kernel(%arg0: i32, %arg1: i32, %arg2: memref<1x4x256xf32, #tpu.memory_space<vmem>>, %arg3: memref<4x64xbf16, #tpu.memory_space<vmem>>, %arg4: memref<1x64xf32, #tpu.memory_space<vmem>>, %arg5: memref<64x128xbf16, #tpu.memory_space<vmem>>, %arg6: memref<1x128xf32, #tpu.memory_space<vmem>>, %arg7: memref<128x1024xbf16, #tpu.memory_space<vmem>>, %arg8: memref<1x1x1024xf32, #tpu.memory_space<vmem>>, %arg9: memref<8x1024xf32, #tpu.memory_space<vmem>>) attributes {dimension_semantics = [#tpu.dimension_semantics<parallel>, #tpu.dimension_semantics<arbitrary>], iteration_bounds = array<i64: 2, 1>, scalar_prefetch = 0 : i64, scratch_operands = 1 : i64, tpu.core_type = #tpu.core_type<tc>, window_params = [{transform_indices = @transform_0, window_bounds = array<i64: 1, 4, 256>}, {pipeline_mode = #tpu.pipeline_mode<synchronous>, transform_indices = @transform_1, window_bounds = array<i64: 4, 64>}, {pipeline_mode = #tpu.pipeline_mode<synchronous>, transform_indices = @transform_2, window_bounds = array<i64: 1, 64>}, {pipeline_mode = #tpu.pipeline_mode<synchronous>, transform_indices = @transform_3, window_bounds = array<i64: 64, 128>}, {pipeline_mode = #tpu.pipeline_mode<synchronous>, transform_indices = @transform_4, window_bounds = array<i64: 1, 128>}, {pipeline_mode = #tpu.pipeline_mode<synchronous>, transform_indices = @transform_5, window_bounds = array<i64: 128, 1024>}, {transform_indices = @transform_6, window_bounds = array<i64: 1, 1, 1024>}]} {
    %c0_i32 = arith.constant 0 : i32
    %0 = arith.cmpi eq, %arg1, %c0_i32 : i32
    %1 = arith.extui %0 : i1 to i32
    %c0_i32_0 = arith.constant 0 : i32
    %2 = arith.cmpi ne, %1, %c0_i32_0 : i32
    scf.if %2 {
      %cst_24 = arith.constant 0xFF800000 : f32
      %32 = vector.broadcast %cst_24 : f32 to vector<8x1024xf32>
      %c0_25 = arith.constant 0 : index
      %c0_26 = arith.constant 0 : index
      %33 = vector.load %arg9[%c0_25, %c0_26] : memref<8x1024xf32, #tpu.memory_space<vmem>>, vector<8x1024xf32>
      tpu.vector_store %arg9[%c0_25, %c0_26], %32 {strides = array<i32>} : memref<8x1024xf32, #tpu.memory_space<vmem>>, vector<8x1024xf32>,
    } else {
    }
    %c0 = arith.constant 0 : index
    %c0_1 = arith.constant 0 : index
    %c0_2 = arith.constant 0 : index
    %3 = vector.load %arg2[%c0, %c0_1, %c0_2] : memref<1x4x256xf32, #tpu.memory_space<vmem>>, vector<1x4x256xf32>
    %4 = vector.shape_cast %3 : vector<1x4x256xf32> to vector<4x256xf32>
    %5 = arith.truncf %4 : vector<4x256xf32> to vector<4x256xbf16>
    %c0_3 = arith.constant 0 : index
    %c0_4 = arith.constant 0 : index
    %6 = vector.load %arg3[%c0_3, %c0_4] : memref<4x64xbf16, #tpu.memory_space<vmem>>, vector<4x64xbf16>
    %cst = arith.constant dense<0.000000e+00> : vector<256x64xf32>
    %7 = tpu.matmul %5, %6, %cst {dimension_numbers = #tpu.dot_dimension_numbers<[0], [0], [1], [1], [0, 1, 1, 1], [], []>} : vector<4x256xbf16>, vector<4x64xbf16>, vector<256x64xf32> -> vector<256x64xf32>
    %c0_5 = arith.constant 0 : index
    %c0_6 = arith.constant 0 : index
    %8 = vector.load %arg4[%c0_5, %c0_6] : memref<1x64xf32, #tpu.memory_space<vmem>>, vector<1x64xf32>
    %9 = vector.broadcast %8 : vector<1x64xf32> to vector<256x64xf32>
    %10 = arith.addf %7, %9 : vector<256x64xf32>
    %cst_7 = arith.constant 0.000000e+00 : f32
    %11 = vector.broadcast %cst_7 : f32 to vector<256x64xf32>
    %12 = arith.maximumf %10, %11 : vector<256x64xf32>
    %13 = arith.truncf %12 : vector<256x64xf32> to vector<256x64xbf16>
    %c0_8 = arith.constant 0 : index
    %c0_9 = arith.constant 0 : index
    %14 = vector.load %arg5[%c0_8, %c0_9] : memref<64x128xbf16, #tpu.memory_space<vmem>>, vector<64x128xbf16>
    %cst_10 = arith.constant dense<0.000000e+00> : vector<256x128xf32>
    %15 = tpu.matmul %13, %14, %cst_10 {dimension_numbers = #tpu.dot_dimension_numbers<[1], [0], [0], [1], [0, 0, 1, 1], [], []>} : vector<256x64xbf16>, vector<64x128xbf16>, vector<256x128xf32> -> vector<256x128xf32>
    %c0_11 = arith.constant 0 : index
    %c0_12 = arith.constant 0 : index
    %16 = vector.load %arg6[%c0_11, %c0_12] : memref<1x128xf32, #tpu.memory_space<vmem>>, vector<1x128xf32>
    %17 = vector.broadcast %16 : vector<1x128xf32> to vector<256x128xf32>
    %18 = arith.addf %15, %17 : vector<256x128xf32>
    %cst_13 = arith.constant 0.000000e+00 : f32
    %19 = vector.broadcast %cst_13 : f32 to vector<256x128xf32>
    %20 = arith.maximumf %18, %19 : vector<256x128xf32>
    %21 = arith.truncf %20 : vector<256x128xf32> to vector<256x128xbf16>
    %c0_14 = arith.constant 0 : index
    %c0_15 = arith.constant 0 : index
    %22 = vector.load %arg7[%c0_14, %c0_15] : memref<128x1024xbf16, #tpu.memory_space<vmem>>, vector<128x1024xbf16>
    %cst_16 = arith.constant dense<0.000000e+00> : vector<256x1024xf32>
    %23 = tpu.matmul %21, %22, %cst_16 {dimension_numbers = #tpu.dot_dimension_numbers<[1], [0], [0], [1], [0, 0, 1, 1], [], []>} : vector<256x128xbf16>, vector<128x1024xbf16>, vector<256x1024xf32> -> vector<256x1024xf32>
    %24 = vector.shape_cast %23 : vector<256x1024xf32> to vector<32x8x1024xf32>
    %cst_17 = arith.constant dense<0xFF800000> : vector<8x1024xf32>
    %25 = vector.multi_reduction <maximumf>, %24, %cst_17 [0] : vector<32x8x1024xf32> to vector<8x1024xf32>
    %c0_18 = arith.constant 0 : index
    %c0_19 = arith.constant 0 : index
    %26 = vector.load %arg9[%c0_18, %c0_19] : memref<8x1024xf32, #tpu.memory_space<vmem>>, vector<8x1024xf32>
    %27 = arith.maximumf %26, %25 : vector<8x1024xf32>
    %c0_20 = arith.constant 0 : index
    %c0_21 = arith.constant 0 : index
    %28 = vector.load %arg9[%c0_20, %c0_21] : memref<8x1024xf32, #tpu.memory_space<vmem>>, vector<8x1024xf32>
    tpu.vector_store %arg9[%c0_20, %c0_21], %27 {strides = array<i32>} : memref<8x1024xf32, #tpu.memory_space<vmem>>, vector<8x1024xf32>,
    %c0_i32_22 = arith.constant 0 : i32
    %29 = arith.cmpi eq, %arg1, %c0_i32_22 : i32
    %30 = arith.extui %29 : i1 to i32
    %c0_i32_23 = arith.constant 0 : i32
    %31 = arith.cmpi ne, %30, %c0_i32_23 : i32
    scf.if %31 {
      %c0_24 = arith.constant 0 : index
      %c0_25 = arith.constant 0 : index
      %32 = vector.load %arg9[%c0_24, %c0_25] : memref<8x1024xf32, #tpu.memory_space<vmem>>, vector<8x1024xf32>
      %cst_26 = arith.constant dense<0xFF800000> : vector<1024xf32>
      %33 = vector.multi_reduction <maximumf>, %32, %cst_26 [0] : vector<8x1024xf32> to vector<1024xf32>
      %34 = vector.shape_cast %33 : vector<1024xf32> to vector<1x1024xf32>
      %c0_27 = arith.constant 0 : index
      %c0_28 = arith.constant 0 : index
      %c0_29 = arith.constant 0 : index
      %35 = vector.load %arg8[%c0_27, %c0_28, %c0_29] : memref<1x1x1024xf32, #tpu.memory_space<vmem>>, vector<1x1x1024xf32>
      %36 = vector.shape_cast %35 : vector<1x1x1024xf32> to vector<1x1024xf32>
      %37 = vector.shape_cast %34 : vector<1x1024xf32> to vector<1x1x1024xf32>
      tpu.vector_store %arg8[%c0_27, %c0_28, %c0_29], %37 {strides = array<i32>} : memref<1x1x1024xf32, #tpu.memory_space<vmem>>, vector<1x1x1024xf32>,
    } else {
    }
    return
  }
  func.func @transform_0(%arg0: i32, %arg1: i32) -> (i32, i32, i32) {
    %c0_i32 = arith.constant 0 : i32
    %c0_i32_0 = arith.constant 0 : i32
    return %arg0, %c0_i32, %arg1 : i32, i32, i32
  }
  func.func @transform_1(%arg0: i32, %arg1: i32) -> (i32, i32) {
    %c0_i32 = arith.constant 0 : i32
    %c0_i32_0 = arith.constant 0 : i32
    %c0_i32_1 = arith.constant 0 : i32
    return %c0_i32, %c0_i32_0 : i32, i32
  }
  func.func @transform_2(%arg0: i32, %arg1: i32) -> (i32, i32) {
    %c0_i32 = arith.constant 0 : i32
    %c0_i32_0 = arith.constant 0 : i32
    %c0_i32_1 = arith.constant 0 : i32
    return %c0_i32, %c0_i32_0 : i32, i32
  }
  func.func @transform_3(%arg0: i32, %arg1: i32) -> (i32, i32) {
    %c0_i32 = arith.constant 0 : i32
    %c0_i32_0 = arith.constant 0 : i32
    %c0_i32_1 = arith.constant 0 : i32
    return %c0_i32, %c0_i32_0 : i32, i32
  }
  func.func @transform_4(%arg0: i32, %arg1: i32) -> (i32, i32) {
    %c0_i32 = arith.constant 0 : i32
    %c0_i32_0 = arith.constant 0 : i32
    %c0_i32_1 = arith.constant 0 : i32
    return %c0_i32, %c0_i32_0 : i32, i32
  }
  func.func @transform_5(%arg0: i32, %arg1: i32) -> (i32, i32) {
    %c0_i32 = arith.constant 0 : i32
    %c0_i32_0 = arith.constant 0 : i32
    %c0_i32_1 = arith.constant 0 : i32
    return %c0_i32, %c0_i32_0 : i32, i32
  }
  func.func @transform_6(%arg0: i32, %arg1: i32) -> (i32, i32, i32) {
    %c0_i32 = arith.constant 0 : i32
    %c0_i32_0 = arith.constant 0 : i32
    %c0_i32_1 = arith.constant 0 : i32
    return %arg0, %c0_i32, %c0_i32_0 : i32, i32, i32
  }
}

</mosaic_0001>

<bundles_post_ra>
// kernel: tpu_custom_call.1
= control target key start
LH: loop header
LB: loop body
LE: loop exit
PB: predicated region body
PF: predicated region fallthrough
CT: control target
= control target key end

     0   :  { %s3953_s0 = inlined_call_operand.hbm [shape: f32[2,4,256], index: 0, kind: input, shape index: {}]   ;;  %s3954_s1 = inlined_call_operand.hbm [shape: bf16[4,64], index: 1, kind: input, shape index: {}]   ;;  %s3955_s2 = inlined_call_operand.vmem [shape: f32[1,64], index: 2, kind: input, shape index: {}]   ;;  %s3956_s3 = inlined_call_operand.hbm [shape: bf16[64,128], index: 3, kind: input, shape index: {}]   ;;  %s3957_s4 = inlined_call_operand.vmem [shape: f32[1,128], index: 4, kind: input, shape index: {}]   ;;  %s3958_s5 = inlined_call_operand.hbm [shape: bf16[128,1024], index: 5, kind: input, shape index: {}]   ;;  %s3959_s6 = inlined_call_operand.hbm [shape: f32[2,1,1024], index: 6, kind: output, shape index: {}]  }
   0x1   :  { %3968 = sst [smem:[#allocation31_spill]] %s3954_s1 }
   0x2   :  { %3969 = sst [smem:[#allocation32_spill]] %s3956_s3 }
   0x3   :  { %11 = vsyncpa [#allocation4], 0 }
   0x4   :  { %13 = vsyncpa [#allocation4 + $0x1], 0 }
   0x5   :  { %14 = vsyncpa [#allocation7], 0 }
   0x6   :  { %15 = vsyncpa [#allocation10], 0 }
   0x7   :  { %16 = vsyncpa [#allocation5], 0 }
   0x8   :  { %18 = vsyncpa [#allocation5 + $0x1], 0  ;;  %s3199_s21 = smov 0   ;;  %s3201_s22 = smov 0  }
   0x9   :  { %s3203_s23 = smov 0   ;;  %s3205_s24 = smov 0  }
   0xa   :  { %s3207_s25 = smov 0   ;;  %s3209_s26 = smov 0  }
   0xb LB: > { %s2616_s27 = sadd.s32 4294967295, %s3151_s26   ;;  %s2617_s28 = sadd.s32 4294967294, %s3151_s26   ;;  %s3151_s26 = sphi %s3209_s26, %s24_s26   ;;  %s3147_s25 = sphi %s3207_s25, %s4021_s25   ;;  %s3143_s24 = sphi %s3205_s24, %s4020_s24   ;;  %s3139_s23 = sphi %s3203_s23, %s4019_s23   ;;  %s3135_s22 = sphi %s3201_s22, %s4018_s22   ;;  %s3131_s21 = sphi %s3199_s21, %s4017_s21  }
   0xc   : > { %p58_p0 = scmp.ne.s32.totalorder %s3135_s22, %s3131_s21  ;;  %p3233_p1 = scmp.eq.s32.totalorder %s2616_s27, 0 }
   0xd   : > { %p3237_p2 = scmp.eq.s32.totalorder %s2616_s27, 1  ;;  %p193_p3 = scmp.eq.s32.totalorder %s2617_s28, 1 }
   0xe   : > { %s3970_s29 = scalar_select %p3233_p1, 1, 0 }
   0xf   : > { %s3971_s30 = scalar_select %p3237_p2, 1, 0 }
  0x10   : > { %p3243_p4 = por %p3233_p1, %p58_p0  ;;  %p2618_p5 = scmp.ge.s32.totalorder %s3151_s26, 1 }
  0x11   : > { %p3248_p6 = por %p193_p3, %p58_p0  ;;  %p200_p7 = scmp.lt.s32.totalorder %s3151_s26, 3 }
  0x12   : > { %s3972_s7 = scalar_select %p3243_p4, 1, 0 }
  0x13   : > { %s3973_s8 = scalar_select %p3248_p6, 1, 0 }
  0x14   : > { %p3253_p8 = pnand %p2618_p5, %p200_p7  ;;  %s3153_s10 = smov [#allocation6]  }
  0x15   : > { %s213_s11 = sshll.u32 %s3153_s10, 4  ;;  %s3154_s12 = smov [#allocation8]   ;;  %s214_s11 = int_to_ptr.vmem [resolvable:$true] %s213_s11 }
  0x16   : > { %s3974_s9 = scalar_select %p3253_p8, 1, 0 }
  0x17   : > { %p2869_p10 = pneg %p3253_p8  ;;  %s226_s13 = sshll.u32 %s3154_s12, 4  ;;  %s227_s13 = int_to_ptr.vmem [resolvable:$true] %s226_s13 }
  0x18   : > { %s3155_s15 = smov [#allocation9]   ;;  %s2968_s17 = scalar_lea.vmem %s214_s11, 32 }
  0x19   : > { %p3262_p11 = pnand %p2869_p10, %p3233_p1  ;;  %s242_s16 = sshll.u32 %s3155_s15, 4  ;;  %s243_s16 = int_to_ptr.vmem [resolvable:$true] %s242_s16 }
  0x1a   : > { %p2969_p13 = scmp.ne.s32.totalorder %s214_s11, %s2968_s17  ;;  %p2976_p5 = scmp.lt.s32.totalorder %s214_s11, %s214_s11 }
  0x1b   : > { %p2959_p12 = pneg %p3262_p11  ;;  %p2977_p7 = scmp.lt.s32.totalorder %s2968_s17, %s2968_s17 }
  0x1d   : > { %p2971_p0 = pnand %p2969_p13, %p2959_p12  ;;  %p2978_p9 = por %p2977_p7, %p2976_p5 }
  0x1f   : > { %p2972_p3 = pneg %p2971_p0 }
  0x21   : > { %p2979_p10 = pnand %p2978_p9, %p2972_p3 }
  0x23   : > { %2982 = shalt.err (!%p2979_p10)
}
  0x24   : > { %s3976_s1 = sld [smem:[#allocation31_spill]]  ;;  %s2994_s20 = scalar_lea.vmem %s227_s13, 512 }
  0x25   : > { %p2995_p6 = scmp.ne.s32.totalorder %s227_s13, %s2994_s20  ;;  %p3002_p13 = scmp.lt.s32.totalorder %s227_s13, %s227_s13 }
  0x26   : > { %p3003_p0 = scmp.lt.s32.totalorder %s2994_s20, %s2994_s20 }
  0x27   : > { %p2997_p1 = pnand %p2995_p6, %p2959_p12 }
  0x28   : > { %p3004_p8 = por %p3003_p0, %p3002_p13 }
  0x29   : > { %p2998_p4 = pneg %p2997_p1 }
  0x2a   : > { %2872 = dma.hbm_to_vmem [thread:$0]  (!%p3262_p11), %s3976_s1, 32, %s214_s11, [#allocation7]  }
  0x2b   : > { %p3005_p2 = pnand %p3004_p8, %p2998_p4 }
  0x2d   : > { %3008 = shalt.err (!%p3005_p2)
}
  0x2e   : > { %s3156_s27 = smov 64   ;;  %s3157_s28 = smov 4  }
  0x2f   : > { %s3977_s3 = sld [smem:[#allocation32_spill]]  ;;  %s3020_s11 = scalar_lea.vmem %s243_s16, 8192 }
  0x30   : > { %p3021_p9 = scmp.ne.s32.totalorder %s243_s16, %s3020_s11  ;;  %p3028_p3 = scmp.lt.s32.totalorder %s243_s16, %s243_s16 }
  0x31   : > { %p3029_p5 = scmp.lt.s32.totalorder %s3020_s11, %s3020_s11 }
  0x32   : > { %p3023_p1 = pnand %p3021_p9, %p2959_p12 }
  0x33   : > { %p3030_p4 = por %p3029_p5, %p3028_p3 }
  0x34   : > { %p3024_p6 = pneg %p3023_p1 }
  0x35   : > { %2875 = dma.hbm_to_vmem [thread:$0]  (!%p3262_p11), %s3977_s3, 512, %s227_s13, [#allocation7], %s3156_s27, %s3156_s27, %s3157_s28  }
  0x36   : > { %p3031_p2 = pnand %p3030_p4, %p3024_p6 }
  0x38   : > { %3034 = shalt.err (!%p3031_p2)
}
  0x39   : > { %s3158_s15 = smov 512   ;;  %s3159_s13 = smov 32  }
  0x3a   : > { %2878 = dma.hbm_to_vmem [thread:$0]  (!%p3262_p11), %s3958_s5, 8192, %s243_s16, [#allocation10], %s3158_s15, %s3158_s15, %s3159_s13  }
  0x3b   : > { %s45_s19 = sadd.s32 1, %s3139_s23  ;;  %s36_s20 = sadd.s32 1, %s3147_s25 }
  0x3c   : > { %p52_p8 = scmp.ne.s32.totalorder %s3139_s23, %s3135_s22  ;;  %p38_p12 = scmp.ge.s32.totalorder %s36_s20, 2 }
  0x3d   : > { %p53_p7 = scmp.eq.s32.totalorder %s3151_s26, 0  ;;  %p3978_p10 = scmp.ne.s32.totalorder %s3971_s30, 0 }
  0x3e   : > { %p2890_p0 = scmp.lt.s32.totalorder %s3151_s26, 2  ;;  %s4023_s20 = smov (%p38_p12, %s36_s20), 0 }
  0x3f   : > { %p3299_p13 = por %p3978_p10, %p52_p8  ;;  %p54_p9 = por %p53_p7, %p52_p8 }
  0x40   : > { %s256_s14 = sand.u32 1, %s3139_s23   ;;  %s40_s28 = ssub.s32 %s3147_s25, %s4023_s20 }
  0x41   : > { %p43_p1 = scmp.eq.s32.totalorder %s40_s28, 0  ;;  %s2623_s16 = sshll.u32 %s256_s14, 3 }
  0x42   : > { %s2739_s10 = sshll.u32 %s3147_s25, 7  ;;  %s260_s13 = scalar_lea.vmem [#allocation3], %s2623_s16 }
  0x43   : > { %s3311_s12 = scalar_select %p43_p1, %s3139_s23, %s45_s19  }
  0x44   : > { %s268_s30 = scalar_lea.hbm %s3953_s0, %s2739_s10  ;;  %s270_s17 = sshll.u32 %s260_s13, 4  ;;  %s271_s17 = int_to_ptr.vmem [resolvable:$true] %s270_s17 }
  0x45   : > { %p3318_p11 = pnand %p2890_p0, %p54_p9  ;;  %s257_s1 = scalar_lea.sflag [#allocation4], %s256_s14 }
  0x46   : > { %s3048_s28 = scalar_lea.vmem %s271_s17, 128  ;;  %s3160_s19 = smov [#allocation3]  }
  0x47   : > { %p3037_p6 = pneg %p3318_p11  ;;  %p3049_p3 = scmp.ne.s32.totalorder %s271_s17, %s3048_s28 }
  0x48   : > { %s3053_s3 = sshll.u32 %s3160_s19, 4  ;;  %s3054_s3 = int_to_ptr.vmem [resolvable:$false] %s3053_s3 }
  0x49   : > { %p3051_p5 = pnand %p3049_p3, %p3037_p6  ;;  %s3055_s10 = scalar_lea.vmem %s3054_s3, 256 }
  0x4a   : > { %p3056_p2 = scmp.lt.s32.totalorder %s271_s17, %s3054_s3  ;;  %p3057_p8 = scmp.lt.s32.totalorder %s3055_s10, %s3048_s28 }
  0x4b   : > { %p3052_p4 = pneg %p3051_p5 }
  0x4c   : > { %p3058_p12 = por %p3057_p8, %p3056_p2 }
  0x4e   : > { %p3059_p7 = pnand %p3058_p12, %p3052_p4 }
  0x50   : > { %3062 = shalt.err (!%p3059_p7)
}
  0x51   : > { %2882 = dma.hbm_to_vmem [thread:$0]  (!%p3318_p11), %s268_s30, 128, %s271_s17, %s257_s1  }
  0x52   : > { %p3981_p10 = scmp.ne.s32.totalorder %s3974_s9, 0 }
  0x54   : > { %279 = sbr.rel (%p3981_p10) target bundleno = 1099 (0x44b), region = 44 }
  0x59   : > { %s3329_s14 = sand.u32 1, %s3135_s22   ;;  %p3982_p0 = scmp.ne.s32.totalorder %s3972_s7, 0 }
  0x5a   : > { %s2627_s16 = sshll.u32 %s3329_s14, 3  ;;  %s282_s11 = scalar_lea.sflag [#allocation4], %s3329_s14 }
  0x5b   : > { %s285_s3 = scalar_lea.vmem [#allocation3], %s2627_s16 }
  0x5c   : > { %3114 = dma.done.wait (%p3982_p0), %s282_s11, 128  }
  0x5d   : > { %3116 = vsyncadd (%p3982_p0), %s282_s11, 4294967168  ;;  %p3983_p9 = scmp.ne.s32.totalorder %s3970_s29, 0 }
  0x5f   : > { %3118 = dma.done.wait (%p3983_p9), [#allocation7], 544  }
  0x60   : > { %3120 = vsyncadd (%p3983_p9), [#allocation7], 4294966752 }
  0x61   : > { %3122 = dma.done.wait (%p3983_p9), [#allocation10], 8192  }
  0x62   : > { %3124 = vsyncadd (%p3983_p9), [#allocation10], 4294959104  ;;  %vm435_vm0 = vcmask 1041408   ;;  %v340_v0 = vld [vmem:[%s285_s3] sm:$0xff]  ;;  %v346_v1 = vld [vmem:[#allocation6] sm:$0x3] }
  0x63   : > { %v344_v2 = vpack.c.bf16 %v340_v0, %v340_v0  ;;  %2852 = vmatprep.subr.msk.bf16.mxu0 %vm435_vm0, %v346_v1  ;;  %v437_v3 = vsel %vm435_vm0, %v346_v1, 0  ;;  %v342_v4 = vcombine.high %v340_v0, %v340_v0  ;;  %v2953_v6 = vld [vmem:[#allocation8 + $0x18] sm:$0xff]   ;;  %vm386_vm1 = vcmask 31744   ;;  %v2954_v23 = vld [vmem:[#allocation8 + $0x10] sm:$0xff]   ;;  %v2955_v24 = vld [vmem:[#allocation8 + $0x8] sm:$0xff]   ;;  %s2740_s15 = sshll.u32 %s3143_s24, 7 }
  0x64   : > { %2779 = vmatpush3.bf16.msra.mxu0 %v437_v3  ;;  %2812 = vmatprep.subr.bf16.mxu1 %v2953_v6  ;;  %v2956_v25 = vld [vmem:[#allocation8] sm:$0xff]   ;;  %v3363_v28 = vld [vmem:[#allocation9 + $0x1c8] sm:$0xff]  ;;  %vm687_vm2 = vcmask 523264   ;;  %s325_s30 = scalar_lea.vmem [#allocation11], %s2627_s16  ;;  %s2504_s28 = scalar_lea.hbm %s3959_s6, %s2740_s15 }
  0x65   : > { %354 = vxpose.xlu0.c.b16.start.end [1/1] (short) %v344_v2, 128  ;;  %v345_v5 = vpack.c.bf16 %v342_v4, %v342_v4  ;;  %2813 = vmatpush3.bf16.msra.mxu1 %v2953_v6  ;;  %v1001_v26 = vld [vmem:[#allocation9 + $0x1c0] sm:$0xff]  ;;  %v3365_v31 = vld [vmem:[#allocation9 + $0x1e8] sm:$0xff]  ;;  %s2506_s13 = sshll.u32 %s325_s30, 4  ;;  %s2492_s19 = scalar_lea.sflag [#allocation5], %s3329_s14  ;;  %s2507_s13 = int_to_ptr.vmem [resolvable:$true] %s2506_s13 }
  0x66   : > { %2814 = vmatprep.subr.bf16.mxu1 %v2954_v23  ;;  %v1005_v27 = vld [vmem:[#allocation9 + $0x1e0] sm:$0xff]  ;;  %v2728_v34 = vcombine.low %v3363_v28, %v3365_v31  ;;  %v2729_v35 = vcombine.high %v3363_v28, %v3365_v31  ;;  %v3374_v60 = vld [vmem:[%s3955_s2] ss:$0 sm:$0xff]  ;;  %s3063_s10 = scalar_lea.vmem %s2507_s13, 128  ;;  %s3163_s24 = smov [#allocation11]  }
  0x67   : > { %v2726_v29 = vcombine.low %v1001_v26, %v1005_v27  ;;  %v2727_v30 = vcombine.high %v1001_v26, %v1005_v27  ;;  %v993_v32 = vld [vmem:[#allocation9 + $0x180] sm:$0xff]  ;;  %p3064_p1 = scmp.ne.s32.totalorder %s2507_s13, %s3063_s10  ;;  %s3067_s16 = sshll.u32 %s3163_s24, 4  ;;  %s3068_s16 = int_to_ptr.vmem [resolvable:$false] %s3067_s16 }
  0x68   : > { %v997_v33 = vld [vmem:[#allocation9 + $0x1a0] sm:$0xff]  ;;  %s3069_s11 = scalar_lea.vmem %s3068_s16, 256  ;;  %p3070_p3 = scmp.lt.s32.totalorder %s2507_s13, %s3068_s16 }
  0x69   : > { %2815 = vmatpush3.bf16.msra.mxu1 %v2954_v23  ;;  %v2719_v36 = vcombine.high %v993_v32, %v997_v33  ;;  %v985_v37 = vld [vmem:[#allocation9 + $0x140] sm:$0xff]  ;;  %1329 = vmatprep.subr.bf16.mxu0 %v2727_v30  ;;  %v2718_v39 = vcombine.low %v993_v32, %v997_v33  ;;  %v978_v30 = vld [vmem:[#allocation9 + $0x108] sm:$0xff]  ;;  %p3065_p11 = pnand %p3064_p1, %p3299_p13  ;;  %p3071_p5 = scmp.lt.s32.totalorder %s3069_s11, %s3063_s10 }
  0x6a   : > { %2816 = vmatprep.subr.bf16.mxu1 %v2955_v24  ;;  %v989_v38 = vld [vmem:[#allocation9 + $0x160] sm:$0xff]  ;;  %v982_v32 = vld [vmem:[#allocation9 + $0x128] sm:$0xff] }
  0x6b   : > { %v2711_v40 = vcombine.high %v985_v37, %v989_v38  ;;  %v977_v41 = vld [vmem:[#allocation9 + $0x100] sm:$0xff]  ;;  %v2710_v43 = vcombine.low %v985_v37, %v989_v38  ;;  %v2705_v28 = vcombine.high %v978_v30, %v982_v32  ;;  %p3066_p6 = pneg %p3065_p11  ;;  %p3072_p4 = por %p3071_p5, %p3070_p3 }
  0x6c   : > { %v981_v42 = vld [vmem:[#allocation9 + $0x120] sm:$0xff] }
  0x6d   : > { %2817 = vmatpush3.bf16.msra.mxu1 %v2955_v24  ;;  %v2703_v44 = vcombine.high %v977_v41, %v981_v42  ;;  %v969_v45 = vld [vmem:[#allocation9 + $0xc0] sm:$0xff]  ;;  %v2702_v47 = vcombine.low %v977_v41, %v981_v42  ;;  %v974_v41 = vld [vmem:[#allocation9 + $0xe8] sm:$0xff]  ;;  %p3073_p2 = pnand %p3072_p4, %p3066_p6 }
  0x6e   : > { %2818 = vmatprep.subr.bf16.mxu1 %v2956_v25  ;;  %v973_v46 = vld [vmem:[#allocation9 + $0xe0] sm:$0xff] }
  0x6f   : > { %v2695_v48 = vcombine.high %v969_v45, %v973_v46  ;;  %v961_v49 = vld [vmem:[#allocation9 + $0x80] sm:$0xff]  ;;  %v2694_v51 = vcombine.low %v969_v45, %v973_v46 }
  0x70   : > { %v965_v50 = vld [vmem:[#allocation9 + $0xa0] sm:$0xff] }
  0x71   : > { %2819 = vmatpush3.bf16.msra.mxu1 %v2956_v25  ;;  %v2687_v52 = vcombine.high %v961_v49, %v965_v50  ;;  %v953_v53 = vld [vmem:[#allocation9 + $0x40] sm:$0xff]  ;;  %v2686_v55 = vcombine.low %v961_v49, %v965_v50 }
  0x72   : > { %1522 = vmatprep.subr.bf16.mxu1 %v2729_v35  ;;  %v957_v54 = vld [vmem:[#allocation9 + $0x60] sm:$0xff] }
  0x73   : > { %v2679_v56 = vcombine.high %v953_v53, %v957_v54  ;;  %v2678_v57 = vcombine.low %v953_v53, %v957_v54 }
  0x82   : > { %370 = vxpose.xlu0.c.b16.start.end [1/1] (short) %v345_v5, 128 }
  0xc7   : > { %v362_v7 = vpop.trf.xlu0 }
  0xc8   : > { %2780 = vmatprep.mubr.msk.bf16.mxu0 %vm386_vm1, %v362_v7  ;;  %v994_v7 = vld [vmem:[#allocation9 + $0x188] sm:$0xff] }
  0xcb   : > { %v363_v8 = vpop.trf.xlu0 }
  0xcc   : > { %2781 = vmatmul.mubr.msk.bf16.vlgmr.msra.gmra.mxu0 %vm386_vm1, %v363_v8  ;;  %v998_v8 = vld [vmem:[#allocation9 + $0x1a8] sm:$0xff] }
  0xcd   : > { %1330 = vmatpush1.bf16.msra.mxu0 %v2726_v29  ;;  %v2720_v25 = vcombine.low %v994_v7, %v998_v8 }
  0xce   : > { %1331 = vmatprep.subr.bf16.mxu0 %v2719_v36 }
  0xcf   : > { %v364_v9 = vpop.trf.xlu0 }
  0xd0   : > { %2784 = vmatprep.mubr.msk.bf16.mxu0 %vm386_vm1, %v364_v9 }
  0xd1   : > { %1332 = vmatpush1.bf16.msra.mxu0 %v2718_v39 }
  0xd2   : > { %1333 = vmatprep.subr.bf16.mxu0 %v2711_v40 }
  0xd3   : > { %v365_v10 = vpop.trf.xlu0 }
  0xd4   : > { %2785 = vmatmul.mubr.msk.bf16.gmra.mxu0 %vm386_vm1, %v365_v10 }
  0xd5   : > { %1334 = vmatpush1.bf16.msra.mxu0 %v2710_v43 }
  0xd6   : > { %1335 = vmatprep.subr.bf16.mxu0 %v2703_v44 }
  0xd7   : > { %v366_v11 = vpop.trf.xlu0 }
  0xd8   : > { %2788 = vmatprep.mubr.msk.bf16.mxu0 %vm386_vm1, %v366_v11 }
  0xd9   : > { %1336 = vmatpush1.bf16.msra.mxu0 %v2702_v47  ;;  %v2704_v47 = vcombine.low %v978_v30, %v982_v32 }
  0xda   : > { %1337 = vmatprep.subr.bf16.mxu0 %v2695_v48 }
  0xdb   : > { %v367_v12 = vpop.trf.xlu0 }
  0xdc   : > { %2789 = vmatmul.mubr.msk.bf16.gmra.mxu0 %vm386_vm1, %v367_v12 }
  0xdd   : > { %1338 = vmatpush1.bf16.msra.mxu0 %v2694_v51  ;;  %v962_v51 = vld [vmem:[#allocation9 + $0x88] sm:$0xff] }
  0xde   : > { %1339 = vmatprep.subr.bf16.mxu0 %v2687_v52  ;;  %v966_v52 = vld [vmem:[#allocation9 + $0xa8] sm:$0xff] }
  0xdf   : > { %v368_v13 = vpop.trf.xlu0 }
  0xe0   : > { %2792 = vmatprep.mubr.msk.bf16.mxu0 %vm386_vm1, %v368_v13 }
  0xe1   : > { %1340 = vmatpush1.bf16.msra.mxu0 %v2686_v55 }
  0xe2   : > { %1341 = vmatprep.subr.bf16.mxu0 %v2679_v56 }
  0xe3   : > { %v369_v14 = vpop.trf.xlu0 }
  0xe4   : > { %2793 = vmatmul.mubr.msk.bf16.gmra.mxu0 %vm386_vm1, %v369_v14 }
  0xe5   : > { %1342 = vmatpush1.bf16.msra.mxu0 %v2678_v57 }
  0xe7   : > { %v378_v15 = vpop.trf.xlu0 }
  0xe8   : > { %2796 = vmatprep.mubr.msk.bf16.mxu0 %vm386_vm1, %v378_v15 }
  0xeb   : > { %v379_v16 = vpop.trf.xlu0 }
  0xec   : > { %2797 = vmatmul.mubr.msk.bf16.gmra.mxu0 %vm386_vm1, %v379_v16  ;;  %v2721_v16 = vcombine.high %v994_v7, %v998_v8 }
  0xef   : > { %v380_v17 = vpop.trf.xlu0 }
  0xf0   : > { %2800 = vmatprep.mubr.msk.bf16.mxu0 %vm386_vm1, %v380_v17 }
  0xf3   : > { %v381_v18 = vpop.trf.xlu0 }
  0xf4   : > { %2801 = vmatmul.mubr.msk.bf16.gmra.mxu0 %vm386_vm1, %v381_v18  ;;  %v986_v18 = vld [vmem:[#allocation9 + $0x148] sm:$0xff] }
  0xf7   : > { %v382_v19 = vpop.trf.xlu0 }
  0xf8   : > { %2804 = vmatprep.mubr.msk.bf16.mxu0 %vm386_vm1, %v382_v19  ;;  %v990_v19 = vld [vmem:[#allocation9 + $0x168] sm:$0xff] }
  0xf9   : > { %v2713_v27 = vcombine.high %v986_v18, %v990_v19  ;;  %v2712_v39 = vcombine.low %v986_v18, %v990_v19 }
  0xfb   : > { %v383_v20 = vpop.trf.xlu0 }
  0xfc   : > { %2805 = vmatmul.mubr.msk.bf16.gmra.mxu0 %vm386_vm1, %v383_v20 }
  0xff   : > { %v384_v21 = vpop.trf.xlu0 }
 0x100   : > { %2808 = vmatprep.mubr.msk.bf16.mxu0 %vm386_vm1, %v384_v21 }
 0x103   : > { %v385_v22 = vpop.trf.xlu0 }
 0x104   : > { %2809 = vmatmul.mubr.msk.bf16.gmra.mxu0 %vm386_vm1, %v385_v22 }
 0x18c   : > { %v2782_v58 = vpop.f32.mrf.mxu0 }
 0x18d   : > { %v482_v0 = vadd.f32 %v2782_v58, %v3374_v60 }
 0x18e   : > { %v473_v59 = vpop.f32.mrf.mxu0 }
 0x18f   : > { %v474_v62 = vadd.f32 %v3374_v60, %v473_v59  ;;  %v602_v9 = vmax.f32 %v482_v0, 0.0  ;;  %v958_v0 = vld [vmem:[#allocation9 + $0x68] sm:$0xff] }
 0x190   : > { %v2783_v61 = vpop.f32.mrf.mxu0 }
 0x191   : > { %v485_v63 = vadd.f32 %v2783_v61, %v3374_v60  ;;  %v600_v5 = vmax.f32 %v474_v62, 0.0  ;;  %v2689_v61 = vcombine.high %v962_v51, %v966_v52 }
 0x192   : > { %v476_v1 = vpop.f32.mrf.mxu0 }
 0x193   : > { %v477_v2 = vadd.f32 %v3374_v60, %v476_v1  ;;  %v603_v3 = vmax.f32 %v485_v63, 0.0  ;;  %v954_v63 = vld [vmem:[#allocation9 + $0x48] sm:$0xff] }
 0x194   : > { %v2786_v4 = vpop.f32.mrf.mxu0  ;;  %v2681_v8 = vcombine.high %v954_v63, %v958_v0 }
 0x195   : > { %v601_v6 = vmax.f32 %v477_v2, 0.0  ;;  %v498_v10 = vadd.f32 %v2786_v4, %v3374_v60  ;;  %v633_v14 = vpack.c.bf16 %v603_v3, %v602_v9 }
 0x196   : > { %v489_v11 = vpop.f32.mrf.mxu0 }
 0x197   : > { %v490_v12 = vadd.f32 %v3374_v60, %v489_v11  ;;  %v632_v13 = vpack.c.bf16 %v601_v6, %v600_v5  ;;  %v606_v20 = vmax.f32 %v498_v10, 0.0  ;;  %v2688_v6 = vcombine.low %v962_v51, %v966_v52 }
 0x198   : > { %v2787_v15 = vpop.f32.mrf.mxu0 }
 0x199   : > { %v501_v17 = vadd.f32 %v2787_v15, %v3374_v60  ;;  %2820 = vmatprep.mubr.msk.bf16.mxu1 %vm687_vm2, %v632_v13  ;;  %v604_v22 = vmax.f32 %v490_v12, 0.0  ;;  %v2680_v15 = vcombine.low %v954_v63, %v958_v0 }
 0x19a   : > { %v492_v21 = vpop.f32.mrf.mxu0  ;;  %2821 = vmatmul.mubr.msk.bf16.vlgmr.msra.gmra.mxu1 %vm687_vm2, %v633_v14 }
 0x19b   : > { %v607_v23 = vmax.f32 %v501_v17, 0.0  ;;  %v493_v24 = vadd.f32 %v3374_v60, %v492_v21  ;;  %1523 = vmatpush1.bf16.msra.mxu1 %v2728_v34  ;;  %v970_v34 = vld [vmem:[#allocation9 + $0xc8] sm:$0xff] }
 0x19c   : > { %v2790_v26 = vpop.f32.mrf.mxu0  ;;  %1524 = vmatprep.subr.bf16.mxu1 %v2721_v16  ;;  %v2697_v49 = vcombine.high %v970_v34, %v974_v41  ;;  %v2696_v58 = vcombine.low %v970_v34, %v974_v41 }
 0x19d   : > { %v605_v29 = vmax.f32 %v493_v24, 0.0  ;;  %v635_v33 = vpack.c.bf16 %v607_v23, %v606_v20  ;;  %v514_v35 = vadd.f32 %v2790_v26, %v3374_v60 }
 0x19e   : > { %v505_v36 = vpop.f32.mrf.mxu0 }
 0x19f   : > { %v634_v37 = vpack.c.bf16 %v605_v29, %v604_v22  ;;  %v506_v38 = vadd.f32 %v3374_v60, %v505_v36  ;;  %1525 = vmatpush1.bf16.msra.mxu1 %v2720_v25  ;;  %v610_v42 = vmax.f32 %v514_v35, 0.0 }
 0x1a0   : > { %v2791_v40 = vpop.f32.mrf.mxu0  ;;  %1526 = vmatprep.subr.bf16.mxu1 %v2713_v27 }
 0x1a1   : > { %2824 = vmatprep.mubr.msk.bf16.mxu1 %vm687_vm2, %v634_v37  ;;  %v517_v31 = vadd.f32 %v2791_v40, %v3374_v60  ;;  %v608_v44 = vmax.f32 %v506_v38, 0.0 }
 0x1a2   : > { %2825 = vmatmul.mubr.msk.bf16.gmra.mxu1 %vm687_vm2, %v635_v33  ;;  %v508_v43 = vpop.f32.mrf.mxu0 }
 0x1a3   : > { %v611_v45 = vmax.f32 %v517_v31, 0.0  ;;  %v509_v46 = vadd.f32 %v3374_v60, %v508_v43  ;;  %1527 = vmatpush1.bf16.msra.mxu1 %v2712_v39 }
 0x1a4   : > { %v2794_v48 = vpop.f32.mrf.mxu0  ;;  %1528 = vmatprep.subr.bf16.mxu1 %v2705_v28 }
 0x1a5   : > { %v609_v50 = vmax.f32 %v509_v46, 0.0  ;;  %v637_v53 = vpack.c.bf16 %v611_v45, %v610_v42  ;;  %v530_v54 = vadd.f32 %v2794_v48, %v3374_v60 }
 0x1a6   : > { %v521_v55 = vpop.f32.mrf.mxu0 }
 0x1a7   : > { %v636_v56 = vpack.c.bf16 %v609_v50, %v608_v44  ;;  %v522_v57 = vadd.f32 %v3374_v60, %v521_v55  ;;  %1529 = vmatpush1.bf16.msra.mxu1 %v2704_v47  ;;  %v614_v1 = vmax.f32 %v530_v54, 0.0 }
 0x1a8   : > { %v2795_v59 = vpop.f32.mrf.mxu0  ;;  %1530 = vmatprep.subr.bf16.mxu1 %v2697_v49 }
 0x1a9   : > { %2828 = vmatprep.mubr.msk.bf16.mxu1 %vm687_vm2, %v636_v56  ;;  %v533_v62 = vadd.f32 %v2795_v59, %v3374_v60  ;;  %v612_v3 = vmax.f32 %v522_v57, 0.0 }
 0x1aa   : > { %2829 = vmatmul.mubr.msk.bf16.gmra.mxu1 %vm687_vm2, %v637_v53  ;;  %v524_v2 = vpop.f32.mrf.mxu0 }
 0x1ab   : > { %v615_v4 = vmax.f32 %v533_v62, 0.0  ;;  %v525_v5 = vadd.f32 %v3374_v60, %v524_v2  ;;  %1531 = vmatpush1.bf16.msra.mxu1 %v2696_v58 }
 0x1ac   : > { %v2798_v7 = vpop.f32.mrf.mxu0  ;;  %1532 = vmatprep.subr.bf16.mxu1 %v2689_v61 }
 0x1ad   : > { %v613_v9 = vmax.f32 %v525_v5, 0.0  ;;  %v639_v10 = vpack.c.bf16 %v615_v4, %v614_v1  ;;  %v546_v11 = vadd.f32 %v2798_v7, %v3374_v60  ;;  %v945_v5 = vld [vmem:[#allocation9] sm:$0xff]  ;;  %v946_v7 = vld [vmem:[#allocation9 + $0x8] sm:$0xff] }
 0x1ae   : > { %v537_v12 = vpop.f32.mrf.mxu0 }
 0x1af   : > { %v638_v13 = vpack.c.bf16 %v613_v9, %v612_v3  ;;  %v538_v14 = vadd.f32 %v3374_v60, %v537_v12  ;;  %1533 = vmatpush1.bf16.msra.mxu1 %v2688_v6  ;;  %v618_v18 = vmax.f32 %v546_v11, 0.0  ;;  %v949_v6 = vld [vmem:[#allocation9 + $0x20] sm:$0xff]  ;;  %v950_v9 = vld [vmem:[#allocation9 + $0x28] sm:$0xff] }
 0x1b0   : > { %v2799_v16 = vpop.f32.mrf.mxu0  ;;  %1534 = vmatprep.subr.bf16.mxu1 %v2681_v8  ;;  %v2671_v8 = vcombine.high %v945_v5, %v949_v6  ;;  %v2672_v11 = vcombine.low %v946_v7, %v950_v9  ;;  %v2673_v12 = vcombine.high %v946_v7, %v950_v9 }
 0x1b1   : > { %2832 = vmatprep.mubr.msk.bf16.mxu1 %vm687_vm2, %v638_v13  ;;  %v549_v17 = vadd.f32 %v2799_v16, %v3374_v60  ;;  %v616_v20 = vmax.f32 %v538_v14, 0.0  ;;  %v1003_v13 = vld [vmem:[#allocation9 + $0x1d0] sm:$0xff] }
 0x1b2   : > { %2833 = vmatmul.mubr.msk.bf16.gmra.mxu1 %vm687_vm2, %v639_v10  ;;  %v540_v19 = vpop.f32.mrf.mxu0  ;;  %v2670_v10 = vcombine.low %v945_v5, %v949_v6  ;;  %1343 = vmatprep.subr.bf16.mxu0 %v2671_v8  ;;  %v1007_v14 = vld [vmem:[#allocation9 + $0x1f0] sm:$0xff]  ;;  %v976_v5 = vld [vmem:[#allocation9 + $0xf8] sm:$0xff] }
 0x1b3   : > { %v619_v21 = vmax.f32 %v549_v17, 0.0  ;;  %v541_v22 = vadd.f32 %v3374_v60, %v540_v19  ;;  %1535 = vmatpush1.bf16.msra.mxu1 %v2680_v15  ;;  %v1004_v15 = vld [vmem:[#allocation9 + $0x1d8] sm:$0xff]  ;;  %v2730_v16 = vcombine.low %v1003_v13, %v1007_v14  ;;  %v2731_v17 = vcombine.high %v1003_v13, %v1007_v14  ;;  %v967_v14 = vld [vmem:[#allocation9 + $0xb0] sm:$0xff] }
 0x1b4   : > { %v2802_v23 = vpop.f32.mrf.mxu0  ;;  %1536 = vmatprep.subr.bf16.mxu1 %v2673_v12  ;;  %1344 = vmatpush1.bf16.msra.mxu0 %v2670_v10  ;;  %v963_v12 = vld [vmem:[#allocation9 + $0x90] sm:$0xff] }
 0x1b5   : > { %v617_v24 = vmax.f32 %v541_v22, 0.0  ;;  %v641_v25 = vpack.c.bf16 %v619_v21, %v618_v18  ;;  %v562_v26 = vadd.f32 %v2802_v23, %v3374_v60  ;;  %v1008_v18 = vld [vmem:[#allocation9 + $0x1f8] sm:$0xff]  ;;  %1715 = vmatprep.subr.bf16.mxu0 %v2731_v17  ;;  %v3432_v23 = vld [vmem:[%s3957_s4] ss:$0 sm:$0xff] }
 0x1b6   : > { %v553_v27 = vpop.f32.mrf.mxu0  ;;  %v2732_v19 = vcombine.low %v1004_v15, %v1008_v18 }
 0x1b7   : > { %v640_v29 = vpack.c.bf16 %v617_v24, %v616_v20  ;;  %v554_v30 = vadd.f32 %v3374_v60, %v553_v27  ;;  %v622_v35 = vmax.f32 %v562_v26, 0.0  ;;  %1537 = vmatpush1.bf16.msra.mxu1 %v2672_v11  ;;  %v2733_v20 = vcombine.high %v1004_v15, %v1008_v18  ;;  %v964_v15 = vld [vmem:[#allocation9 + $0x98] sm:$0xff] }
 0x1b8   : > { %v2803_v32 = vpop.f32.mrf.mxu0 }
 0x1b9   : > { %2836 = vmatprep.mubr.msk.bf16.mxu1 %vm687_vm2, %v640_v29  ;;  %v565_v33 = vadd.f32 %v2803_v32, %v3374_v60  ;;  %v620_v37 = vmax.f32 %v554_v30, 0.0  ;;  %1908 = vmatprep.subr.bf16.mxu1 %v2733_v20  ;;  %v995_v30 = vld [vmem:[#allocation9 + $0x190] sm:$0xff] }
 0x1ba   : > { %2837 = vmatmul.mubr.msk.bf16.gmra.mxu1 %vm687_vm2, %v641_v25  ;;  %v556_v36 = vpop.f32.mrf.mxu0 }
 0x1bb   : > { %v623_v38 = vmax.f32 %v565_v33, 0.0  ;;  %v557_v39 = vadd.f32 %v3374_v60, %v556_v36  ;;  %v996_v36 = vld [vmem:[#allocation9 + $0x198] sm:$0xff] }
 0x1bc   : > { %v2806_v40 = vpop.f32.mrf.mxu0 }
 0x1bd   : > { %v621_v28 = vmax.f32 %v557_v39, 0.0  ;;  %v643_v31 = vpack.c.bf16 %v623_v38, %v622_v35  ;;  %v578_v34 = vadd.f32 %v2806_v40, %v3374_v60  ;;  %v999_v35 = vld [vmem:[#allocation9 + $0x1b0] sm:$0xff] }
 0x1be   : > { %v569_v41 = vpop.f32.mrf.mxu0 }
 0x1bf   : > { %v642_v42 = vpack.c.bf16 %v621_v28, %v620_v37  ;;  %v570_v43 = vadd.f32 %v3374_v60, %v569_v41  ;;  %v626_v46 = vmax.f32 %v578_v34, 0.0  ;;  %v1000_v37 = vld [vmem:[#allocation9 + $0x1b8] sm:$0xff]  ;;  %v987_v28 = vld [vmem:[#allocation9 + $0x150] sm:$0xff]  ;;  %v2723_v34 = vcombine.high %v995_v30, %v999_v35 }
 0x1c0   : > { %v2807_v44 = vpop.f32.mrf.mxu0  ;;  %v2725_v41 = vcombine.high %v996_v36, %v1000_v37 }
 0x1c1   : > { %2840 = vmatprep.mubr.msk.bf16.mxu1 %vm687_vm2, %v642_v42  ;;  %v581_v45 = vadd.f32 %v2807_v44, %v3374_v60  ;;  %v624_v48 = vmax.f32 %v570_v43, 0.0  ;;  %v991_v42 = vld [vmem:[#allocation9 + $0x170] sm:$0xff]  ;;  %v988_v43 = vld [vmem:[#allocation9 + $0x158] sm:$0xff] }
 0x1c2   : > { %2841 = vmatmul.mubr.msk.bf16.gmra.mxu1 %vm687_vm2, %v643_v31  ;;  %v572_v47 = vpop.f32.mrf.mxu0  ;;  %v992_v44 = vld [vmem:[#allocation9 + $0x178] sm:$0xff] }
 0x1c3   : > { %v627_v49 = vmax.f32 %v581_v45, 0.0  ;;  %v573_v50 = vadd.f32 %v3374_v60, %v572_v47  ;;  %v2724_v47 = vcombine.low %v996_v36, %v1000_v37 }
 0x1c4   : > { %v2810_v51 = vpop.f32.mrf.mxu0 }
 0x1c5   : > { %v625_v52 = vmax.f32 %v573_v50, 0.0  ;;  %v645_v53 = vpack.c.bf16 %v627_v49, %v626_v46  ;;  %v594_v54 = vadd.f32 %v2810_v51, %v3374_v60  ;;  %v2722_v46 = vcombine.low %v995_v30, %v999_v35  ;;  %v956_v30 = vld [vmem:[#allocation9 + $0x58] sm:$0xff] }
 0x1c6   : > { %v585_v55 = vpop.f32.mrf.mxu0  ;;  %v2715_v49 = vcombine.high %v987_v28, %v991_v42  ;;  %v2717_v50 = vcombine.high %v988_v43, %v992_v44  ;;  %v2690_v35 = vcombine.low %v963_v12, %v967_v14 }
 0x1c7   : > { %v644_v56 = vpack.c.bf16 %v625_v52, %v624_v48  ;;  %v586_v57 = vadd.f32 %v3374_v60, %v585_v55  ;;  %v630_v61 = vmax.f32 %v594_v54, 0.0  ;;  %v979_v52 = vld [vmem:[#allocation9 + $0x110] sm:$0xff]  ;;  %v980_v55 = vld [vmem:[#allocation9 + $0x118] sm:$0xff] }
 0x1c8   : > { %v2811_v58 = vpop.f32.mrf.mxu0  ;;  %v983_v54 = vld [vmem:[#allocation9 + $0x130] sm:$0xff] }
 0x1c9   : > { %2844 = vmatprep.mubr.msk.bf16.mxu1 %vm687_vm2, %v644_v56  ;;  %v597_v59 = vadd.f32 %v2811_v58, %v3374_v60  ;;  %v628_v63 = vmax.f32 %v586_v57, 0.0  ;;  %v984_v56 = vld [vmem:[#allocation9 + $0x138] sm:$0xff]  ;;  %v2714_v57 = vcombine.low %v987_v28, %v991_v42  ;;  %v2706_v7 = vcombine.low %v979_v52, %v983_v54 }
 0x1ca   : > { %2845 = vmatmul.mubr.msk.bf16.gmra.mxu1 %vm687_vm2, %v645_v53  ;;  %v588_v62 = vpop.f32.mrf.mxu0  ;;  %v2708_v8 = vcombine.low %v980_v55, %v984_v56 }
 0x1cb   : > { %v631_v0 = vmax.f32 %v597_v59, 0.0  ;;  %v589_v1 = vadd.f32 %v3374_v60, %v588_v62  ;;  %v3161_v60 = vmov 0  }
 0x1cc   : > { %1361 = vmatprep.mubr.bf16.mxu0 %v3161_v60 }
 0x1cd   : > { %v629_v2 = vmax.f32 %v589_v1, 0.0  ;;  %v647_v3 = vpack.c.bf16 %v631_v0, %v630_v61  ;;  %v2716_v61 = vcombine.low %v988_v43, %v992_v44  ;;  %v2709_v0 = vcombine.high %v980_v55, %v984_v56  ;;  %v971_v1 = vld [vmem:[#allocation9 + $0xd0] sm:$0xff] }
 0x1cf   : > { %v646_v4 = vpack.c.bf16 %v629_v2, %v628_v63  ;;  %v2707_v63 = vcombine.high %v979_v52, %v983_v54 }
 0x1d1   : > { %2848 = vmatprep.mubr.msk.bf16.mxu1 %vm687_vm2, %v646_v4  ;;  %v972_v4 = vld [vmem:[#allocation9 + $0xd8] sm:$0xff] }
 0x1d2   : > { %2849 = vmatmul.mubr.msk.bf16.gmra.mxu1 %vm687_vm2, %v647_v3  ;;  %v975_v3 = vld [vmem:[#allocation9 + $0xf0] sm:$0xff]  ;;  %v2701_v11 = vcombine.high %v972_v4, %v976_v5  ;;  %v2700_v20 = vcombine.low %v972_v4, %v976_v5 }
 0x1d3   : > { %1554 = vmatprep.mubr.bf16.mxu1 %v3161_v60  ;;  %v2699_v10 = vcombine.high %v971_v1, %v975_v3  ;;  %v2698_v17 = vcombine.low %v971_v1, %v975_v3 }
 0x25a   : > { %v2822_v21 = vpop.f32.mrf.mxu1 }
 0x25b   : > { %v779_v45 = vadd.f32 %v2822_v21, %v3432_v23 }
 0x25c   : > { %v770_v22 = vpop.f32.mrf.mxu1 }
 0x25d   : > { %v771_v25 = vadd.f32 %v3432_v23, %v770_v22  ;;  %v899_v53 = vmax.f32 %v779_v45, 0.0  ;;  %v2691_v22 = vcombine.high %v963_v12, %v967_v14 }
 0x25e   : > { %v2823_v24 = vpop.f32.mrf.mxu1 }
 0x25f   : > { %v897_v32 = vmax.f32 %v771_v25, 0.0  ;;  %v782_v39 = vadd.f32 %v2823_v24, %v3432_v23  ;;  %v955_v25 = vld [vmem:[#allocation9 + $0x50] sm:$0xff] }
 0x260   : > { %v773_v26 = vpop.f32.mrf.mxu1 }
 0x261   : > { %v774_v27 = vadd.f32 %v3432_v23, %v773_v26  ;;  %v900_v48 = vmax.f32 %v782_v39, 0.0  ;;  %v947_v39 = vld [vmem:[#allocation9 + $0x10] sm:$0xff] }
 0x262   : > { %v3436_v29 = vpop.f32.mrf.mxu1 }
 0x263   : > { %v898_v33 = vmax.f32 %v774_v27, 0.0  ;;  %v3446_v58 = vpack.c.bf16 %v900_v48, %v899_v53  ;;  %v795_v26 = vadd.f32 %v3436_v29, %v3432_v23  ;;  %v959_v27 = vld [vmem:[#allocation9 + $0x70] sm:$0xff] }
 0x264   : > { %v786_v38 = vpop.f32.mrf.mxu1  ;;  %v2683_v29 = vcombine.high %v955_v25, %v959_v27  ;;  %v2682_v42 = vcombine.low %v955_v25, %v959_v27 }
 0x265   : > { %v3439_v40 = vpack.c.bf16 %v898_v33, %v897_v32  ;;  %v787_v2 = vadd.f32 %v3432_v23, %v786_v38  ;;  %v960_v32 = vld [vmem:[#allocation9 + $0x78] sm:$0xff]  ;;  %v903_v28 = vmax.f32 %v795_v26, 0.0 }
 0x266   : > { %v2827_v31 = vpop.f32.mrf.mxu1  ;;  %v2685_v38 = vcombine.high %v956_v30, %v960_v32  ;;  %v2684_v43 = vcombine.low %v956_v30, %v960_v32 }
 0x267   : > { %1362 = vmatmul.mubr.bf16.vlgmr.msra.gmra.mxu0 %v3439_v40  ;;  %1555 = vmatmul.mubr.bf16.vlgmr.msra.gmra.mxu1 %v3439_v40  ;;  %v901_v13 = vmax.f32 %v787_v2, 0.0  ;;  %v798_v18 = vadd.f32 %v2827_v31, %v3432_v23  ;;  %v951_v31 = vld [vmem:[#allocation9 + $0x30] sm:$0xff] }
 0x268   : > { %1716 = vmatpush1.bf16.msra.mxu0 %v2730_v16  ;;  %1909 = vmatpush1.bf16.msra.mxu1 %v2732_v19  ;;  %v789_v51 = vpop.f32.mrf.mxu1  ;;  %v968_v16 = vld [vmem:[#allocation9 + $0xb8] sm:$0xff]  ;;  %v2675_v48 = vcombine.high %v947_v39, %v951_v31  ;;  %v2674_v52 = vcombine.low %v947_v39, %v951_v31 }
 0x269   : > { %1371 = vmatprep.mubr.bf16.mxu0 %v3161_v60  ;;  %1564 = vmatprep.mubr.bf16.mxu1 %v3161_v60  ;;  %v790_v59 = vadd.f32 %v3432_v23, %v789_v51  ;;  %v2693_v24 = vcombine.high %v964_v15, %v968_v16  ;;  %v904_v33 = vmax.f32 %v798_v18, 0.0  ;;  %v2692_v36 = vcombine.low %v964_v15, %v968_v16 }
 0x26a   : > { %1717 = vmatprep.subr.bf16.mxu0 %v2723_v34  ;;  %1910 = vmatprep.subr.bf16.mxu1 %v2725_v41  ;;  %v3449_v62 = vpop.f32.mrf.mxu1  ;;  %v948_v34 = vld [vmem:[#allocation9 + $0x18] sm:$0xff] }
 0x26b   : > { %v902_v6 = vmax.f32 %v790_v59, 0.0  ;;  %v952_v41 = vld [vmem:[#allocation9 + $0x38] sm:$0xff]  ;;  %v3465_v44 = vpack.c.bf16 %v904_v33, %v903_v28  ;;  %v811_v55 = vadd.f32 %v3449_v62, %v3432_v23 }
 0x26c   : > { %1718 = vmatpush1.bf16.msra.mxu0 %v2722_v46  ;;  %1911 = vmatpush1.bf16.msra.mxu1 %v2724_v47  ;;  %v802_v9 = vpop.f32.mrf.mxu1  ;;  %v2676_v53 = vcombine.low %v948_v34, %v952_v41 }
 0x26d   : > { %1719 = vmatprep.subr.bf16.mxu0 %v2715_v49  ;;  %1912 = vmatprep.subr.bf16.mxu1 %v2717_v50  ;;  %v3457_v19 = vpack.c.bf16 %v902_v6, %v901_v13  ;;  %v803_v45 = vadd.f32 %v3432_v23, %v802_v9  ;;  %v2677_v49 = vcombine.high %v948_v34, %v952_v41 }
 0x26e   : > { %v2831_v21 = vpop.f32.mrf.mxu1 }
 0x26f   : > { %1372 = vmatmul.mubr.bf16.gmra.mxu0 %v3446_v58  ;;  %1565 = vmatmul.mubr.bf16.gmra.mxu1 %v3446_v58  ;;  %v905_v50 = vmax.f32 %v803_v45, 0.0  ;;  %v814_v56 = vadd.f32 %v2831_v21, %v3432_v23 }
 0x270   : > { %1381 = vmatprep.mubr.bf16.mxu0 %v3161_v60  ;;  %1574 = vmatprep.mubr.bf16.mxu1 %v3161_v60  ;;  %v805_v37 = vpop.f32.mrf.mxu1 }
 0x271   : > { %1720 = vmatpush1.bf16.msra.mxu0 %v2714_v57  ;;  %1913 = vmatpush1.bf16.msra.mxu1 %v2716_v61  ;;  %v806_v46 = vadd.f32 %v3432_v23, %v805_v37  ;;  %v907_v61 = vmax.f32 %v811_v55, 0.0 }
 0x272   : > { %1721 = vmatprep.subr.bf16.mxu0 %v2707_v63  ;;  %1914 = vmatprep.subr.bf16.mxu1 %v2709_v0  ;;  %v2834_v47 = vpop.f32.mrf.mxu1  ;;  %v908_v63 = vmax.f32 %v814_v56, 0.0 }
 0x273   : > { %v906_v51 = vmax.f32 %v806_v46, 0.0 }
 0x274   : > { %v818_v54 = vpop.f32.mrf.mxu1  ;;  %v3482_v1 = vpack.c.bf16 %v908_v63, %v907_v61 }
 0x275   : > { %1722 = vmatpush1.bf16.msra.mxu0 %v2706_v7  ;;  %1915 = vmatpush1.bf16.msra.mxu1 %v2708_v8  ;;  %v3476_v57 = vpack.c.bf16 %v906_v51, %v905_v50  ;;  %v819_v62 = vadd.f32 %v3432_v23, %v818_v54  ;;  %v827_v7 = vadd.f32 %v2834_v47, %v3432_v23 }
 0x276   : > { %1723 = vmatprep.subr.bf16.mxu0 %v2699_v10  ;;  %1916 = vmatprep.subr.bf16.mxu1 %v2701_v11  ;;  %v2835_v59 = vpop.f32.mrf.mxu1 }
 0x277   : > { %1382 = vmatmul.mubr.bf16.gmra.mxu0 %v3457_v19  ;;  %1575 = vmatmul.mubr.bf16.gmra.mxu1 %v3457_v19  ;;  %v909_v4 = vmax.f32 %v819_v62, 0.0  ;;  %v830_v8 = vadd.f32 %v2835_v59, %v3432_v23  ;;  %v911_v11 = vmax.f32 %v827_v7, 0.0 }
 0x278   : > { %1391 = vmatprep.mubr.bf16.mxu0 %v3161_v60  ;;  %1584 = vmatprep.mubr.bf16.mxu1 %v3161_v60  ;;  %v821_v0 = vpop.f32.mrf.mxu1 }
 0x279   : > { %1724 = vmatpush1.bf16.msra.mxu0 %v2698_v17  ;;  %1917 = vmatpush1.bf16.msra.mxu1 %v2700_v20  ;;  %v822_v2 = vadd.f32 %v3432_v23, %v821_v0  ;;  %v912_v12 = vmax.f32 %v830_v8, 0.0 }
 0x27a   : > { %1725 = vmatprep.subr.bf16.mxu0 %v2691_v22  ;;  %1918 = vmatprep.subr.bf16.mxu1 %v2693_v24  ;;  %v2838_v3 = vpop.f32.mrf.mxu1 }
 0x27b   : > { %v910_v5 = vmax.f32 %v822_v2, 0.0  ;;  %v3498_v14 = vpack.c.bf16 %v912_v12, %v911_v11  ;;  %v843_v22 = vadd.f32 %v2838_v3, %v3432_v23 }
 0x27c   : > { %v834_v6 = vpop.f32.mrf.mxu1 }
 0x27d   : > { %1726 = vmatpush1.bf16.msra.mxu0 %v2690_v35  ;;  %1919 = vmatpush1.bf16.msra.mxu1 %v2692_v36  ;;  %v3492_v9 = vpack.c.bf16 %v910_v5, %v909_v4  ;;  %v835_v15 = vadd.f32 %v3432_v23, %v834_v6  ;;  %v915_v27 = vmax.f32 %v843_v22, 0.0 }
 0x27e   : > { %1727 = vmatprep.subr.bf16.mxu0 %v2683_v29  ;;  %1920 = vmatprep.subr.bf16.mxu1 %v2685_v38  ;;  %v2839_v10 = vpop.f32.mrf.mxu1 }
 0x27f   : > { %1392 = vmatmul.mubr.bf16.gmra.mxu0 %v3465_v44  ;;  %1585 = vmatmul.mubr.bf16.gmra.mxu1 %v3465_v44  ;;  %v913_v18 = vmax.f32 %v835_v15, 0.0  ;;  %v846_v24 = vadd.f32 %v2839_v10, %v3432_v23 }
 0x280   : > { %1401 = vmatprep.mubr.bf16.mxu0 %v3161_v60  ;;  %1594 = vmatprep.mubr.bf16.mxu1 %v3161_v60  ;;  %v837_v13 = vpop.f32.mrf.mxu1 }
 0x281   : > { %1728 = vmatpush1.bf16.msra.mxu0 %v2682_v42  ;;  %1921 = vmatpush1.bf16.msra.mxu1 %v2684_v43  ;;  %v838_v16 = vadd.f32 %v3432_v23, %v837_v13  ;;  %v916_v30 = vmax.f32 %v846_v24, 0.0 }
 0x282   : > { %1729 = vmatprep.subr.bf16.mxu0 %v2675_v48  ;;  %1922 = vmatprep.subr.bf16.mxu1 %v2677_v49  ;;  %v2842_v17 = vpop.f32.mrf.mxu1 }
 0x283   : > { %v914_v20 = vmax.f32 %v838_v16, 0.0  ;;  %v3514_v33 = vpack.c.bf16 %v916_v30, %v915_v27  ;;  %v859_v28 = vadd.f32 %v2842_v17, %v3432_v23 }
 0x284   : > { %v850_v21 = vpop.f32.mrf.mxu1 }
 0x285   : > { %1730 = vmatpush1.bf16.msra.mxu0 %v2674_v52  ;;  %1923 = vmatpush1.bf16.msra.mxu1 %v2676_v53  ;;  %v3508_v25 = vpack.c.bf16 %v914_v20, %v913_v18  ;;  %v851_v35 = vadd.f32 %v3432_v23, %v850_v21  ;;  %v919_v42 = vmax.f32 %v859_v28, 0.0 }
 0x286   : > { %v2843_v26 = vpop.f32.mrf.mxu1 }
 0x287   : > { %1402 = vmatmul.mubr.bf16.gmra.mxu0 %v3476_v57  ;;  %1595 = vmatmul.mubr.bf16.gmra.mxu1 %v3476_v57  ;;  %v917_v29 = vmax.f32 %v851_v35, 0.0  ;;  %v862_v31 = vadd.f32 %v2843_v26, %v3432_v23 }
 0x288   : > { %1411 = vmatprep.mubr.bf16.mxu0 %v3161_v60  ;;  %1604 = vmatprep.mubr.bf16.mxu1 %v3161_v60  ;;  %v853_v32 = vpop.f32.mrf.mxu1 }
 0x289   : > { %v854_v36 = vadd.f32 %v3432_v23, %v853_v32  ;;  %v920_v43 = vmax.f32 %v862_v31, 0.0 }
 0x28a   : > { %v2846_v37 = vpop.f32.mrf.mxu1 }
 0x28b   : > { %v918_v38 = vmax.f32 %v854_v36, 0.0  ;;  %v3530_v46 = vpack.c.bf16 %v920_v43, %v919_v42  ;;  %v875_v53 = vadd.f32 %v2846_v37, %v3432_v23 }
 0x28c   : > { %v866_v39 = vpop.f32.mrf.mxu1 }
 0x28d   : > { %v3524_v34 = vpack.c.bf16 %v918_v38, %v917_v29  ;;  %v867_v47 = vadd.f32 %v3432_v23, %v866_v39  ;;  %v923_v59 = vmax.f32 %v875_v53, 0.0 }
 0x28e   : > { %v2847_v41 = vpop.f32.mrf.mxu1 }
 0x28f   : > { %1412 = vmatmul.mubr.bf16.gmra.mxu0 %v3482_v1  ;;  %1605 = vmatmul.mubr.bf16.gmra.mxu1 %v3482_v1  ;;  %v921_v50 = vmax.f32 %v867_v47, 0.0  ;;  %v878_v54 = vadd.f32 %v2847_v41, %v3432_v23 }
 0x290   : > { %1421 = vmatprep.mubr.bf16.mxu0 %v3161_v60  ;;  %1614 = vmatprep.mubr.bf16.mxu1 %v3161_v60  ;;  %v869_v45 = vpop.f32.mrf.mxu1 }
 0x291   : > { %v870_v48 = vadd.f32 %v3432_v23, %v869_v45  ;;  %v924_v61 = vmax.f32 %v878_v54, 0.0 }
 0x292   : > { %v2850_v49 = vpop.f32.mrf.mxu1 }
 0x293   : > { %v922_v51 = vmax.f32 %v870_v48, 0.0  ;;  %v3546_v0 = vpack.c.bf16 %v924_v61, %v923_v59  ;;  %v891_v5 = vadd.f32 %v2850_v49, %v3432_v23 }
 0x294   : > { %v882_v52 = vpop.f32.mrf.mxu1 }
 0x295   : > { %v3540_v55 = vpack.c.bf16 %v922_v51, %v921_v50  ;;  %v883_v62 = vadd.f32 %v3432_v23, %v882_v52  ;;  %v927_v8 = vmax.f32 %v891_v5, 0.0 }
 0x296   : > { %v2851_v56 = vpop.f32.mrf.mxu1 }
 0x297   : > { %1422 = vmatmul.mubr.bf16.gmra.mxu0 %v3492_v9  ;;  %1615 = vmatmul.mubr.bf16.gmra.mxu1 %v3492_v9  ;;  %v925_v3 = vmax.f32 %v883_v62, 0.0  ;;  %v894_v6 = vadd.f32 %v2851_v56, %v3432_v23 }
 0x298   : > { %1431 = vmatprep.mubr.bf16.mxu0 %v3161_v60  ;;  %1624 = vmatprep.mubr.bf16.mxu1 %v3161_v60  ;;  %v885_v63 = vpop.f32.mrf.mxu1 }
 0x299   : > { %v886_v2 = vadd.f32 %v3432_v23, %v885_v63  ;;  %v928_v10 = vmax.f32 %v894_v6, 0.0 }
 0x29b   : > { %v926_v4 = vmax.f32 %v886_v2, 0.0  ;;  %v3562_v11 = vpack.c.bf16 %v928_v10, %v927_v8 }
 0x29d   : > { %v3556_v7 = vpack.c.bf16 %v926_v4, %v925_v3 }
 0x29f   : > { %1432 = vmatmul.mubr.bf16.gmra.mxu0 %v3498_v14  ;;  %1625 = vmatmul.mubr.bf16.gmra.mxu1 %v3498_v14 }
 0x2a0   : > { %1441 = vmatprep.mubr.bf16.mxu0 %v3161_v60  ;;  %1634 = vmatprep.mubr.bf16.mxu1 %v3161_v60 }
 0x2a7   : > { %1442 = vmatmul.mubr.bf16.gmra.mxu0 %v3508_v25  ;;  %1635 = vmatmul.mubr.bf16.gmra.mxu1 %v3508_v25 }
 0x2a8   : > { %1451 = vmatprep.mubr.bf16.mxu0 %v3161_v60  ;;  %1644 = vmatprep.mubr.bf16.mxu1 %v3161_v60 }
 0x2af   : > { %1452 = vmatmul.mubr.bf16.gmra.mxu0 %v3514_v33  ;;  %1645 = vmatmul.mubr.bf16.gmra.mxu1 %v3514_v33 }
 0x2b0   : > { %1461 = vmatprep.mubr.bf16.mxu0 %v3161_v60  ;;  %1654 = vmatprep.mubr.bf16.mxu1 %v3161_v60 }
 0x2b7   : > { %1462 = vmatmul.mubr.bf16.gmra.mxu0 %v3524_v34  ;;  %1655 = vmatmul.mubr.bf16.gmra.mxu1 %v3524_v34 }
 0x2b8   : > { %1471 = vmatprep.mubr.bf16.mxu0 %v3161_v60  ;;  %1664 = vmatprep.mubr.bf16.mxu1 %v3161_v60 }
 0x2bf   : > { %1472 = vmatmul.mubr.bf16.gmra.mxu0 %v3530_v46  ;;  %1665 = vmatmul.mubr.bf16.gmra.mxu1 %v3530_v46 }
 0x2c0   : > { %1481 = vmatprep.mubr.bf16.mxu0 %v3161_v60  ;;  %1674 = vmatprep.mubr.bf16.mxu1 %v3161_v60 }
 0x2c7   : > { %1482 = vmatmul.mubr.bf16.gmra.mxu0 %v3540_v55  ;;  %1675 = vmatmul.mubr.bf16.gmra.mxu1 %v3540_v55 }
 0x2c8   : > { %1491 = vmatprep.mubr.bf16.mxu0 %v3161_v60  ;;  %1684 = vmatprep.mubr.bf16.mxu1 %v3161_v60 }
 0x2cf   : > { %1492 = vmatmul.mubr.bf16.gmra.mxu0 %v3546_v0  ;;  %1685 = vmatmul.mubr.bf16.gmra.mxu1 %v3546_v0 }
 0x2d0   : > { %1501 = vmatprep.mubr.bf16.mxu0 %v3161_v60  ;;  %1694 = vmatprep.mubr.bf16.mxu1 %v3161_v60 }
 0x2d7   : > { %1502 = vmatmul.mubr.bf16.gmra.mxu0 %v3556_v7  ;;  %1695 = vmatmul.mubr.bf16.gmra.mxu1 %v3556_v7 }
 0x2d8   : > { %1511 = vmatprep.mubr.bf16.mxu0 %v3161_v60  ;;  %1704 = vmatprep.mubr.bf16.mxu1 %v3161_v60 }
 0x2df   : > { %1512 = vmatmul.mubr.bf16.gmra.mxu0 %v3562_v11  ;;  %1705 = vmatmul.mubr.bf16.gmra.mxu1 %v3562_v11 }
 0x2e0   : > { %1747 = vmatprep.mubr.bf16.mxu0 %v3161_v60  ;;  %1940 = vmatprep.mubr.bf16.mxu1 %v3161_v60 }
 0x2e7   : > { %1748 = vmatmul.mubr.bf16.vlgmr.msra.gmra.mxu0 %v3439_v40  ;;  %1941 = vmatmul.mubr.bf16.vlgmr.msra.gmra.mxu1 %v3439_v40 }
 0x2e8   : > { %1757 = vmatprep.mubr.bf16.mxu0 %v3161_v60  ;;  %1950 = vmatprep.mubr.bf16.mxu1 %v3161_v60 }
 0x2ef   : > { %1758 = vmatmul.mubr.bf16.gmra.mxu0 %v3446_v58  ;;  %1951 = vmatmul.mubr.bf16.gmra.mxu1 %v3446_v58 }
 0x2f0   : > { %1767 = vmatprep.mubr.bf16.mxu0 %v3161_v60  ;;  %1960 = vmatprep.mubr.bf16.mxu1 %v3161_v60 }
 0x2f7   : > { %1768 = vmatmul.mubr.bf16.gmra.mxu0 %v3457_v19  ;;  %1961 = vmatmul.mubr.bf16.gmra.mxu1 %v3457_v19 }
 0x2f8   : > { %1777 = vmatprep.mubr.bf16.mxu0 %v3161_v60  ;;  %1970 = vmatprep.mubr.bf16.mxu1 %v3161_v60 }
 0x2ff   : > { %1778 = vmatmul.mubr.bf16.gmra.mxu0 %v3465_v44  ;;  %1971 = vmatmul.mubr.bf16.gmra.mxu1 %v3465_v44 }
 0x300   : > { %1787 = vmatprep.mubr.bf16.mxu0 %v3161_v60  ;;  %1980 = vmatprep.mubr.bf16.mxu1 %v3161_v60 }
 0x307   : > { %1788 = vmatmul.mubr.bf16.gmra.mxu0 %v3476_v57  ;;  %1981 = vmatmul.mubr.bf16.gmra.mxu1 %v3476_v57 }
 0x308   : > { %1797 = vmatprep.mubr.bf16.mxu0 %v3161_v60  ;;  %1990 = vmatprep.mubr.bf16.mxu1 %v3161_v60 }
 0x30f   : > { %1798 = vmatmul.mubr.bf16.gmra.mxu0 %v3482_v1  ;;  %1991 = vmatmul.mubr.bf16.gmra.mxu1 %v3482_v1 }
 0x310   : > { %1807 = vmatprep.mubr.bf16.mxu0 %v3161_v60  ;;  %2000 = vmatprep.mubr.bf16.mxu1 %v3161_v60 }
 0x317   : > { %1808 = vmatmul.mubr.bf16.gmra.mxu0 %v3492_v9  ;;  %2001 = vmatmul.mubr.bf16.gmra.mxu1 %v3492_v9 }
 0x318   : > { %1817 = vmatprep.mubr.bf16.mxu0 %v3161_v60  ;;  %2010 = vmatprep.mubr.bf16.mxu1 %v3161_v60 }
 0x31f   : > { %1818 = vmatmul.mubr.bf16.gmra.mxu0 %v3498_v14  ;;  %2011 = vmatmul.mubr.bf16.gmra.mxu1 %v3498_v14 }
 0x320   : > { %1827 = vmatprep.mubr.bf16.mxu0 %v3161_v60  ;;  %2020 = vmatprep.mubr.bf16.mxu1 %v3161_v60 }
 0x327   : > { %v1363_v23 = vpop.f32.mrf.mxu0  ;;  %v1556_v40 = vpop.f32.mrf.mxu1  ;;  %1828 = vmatmul.mubr.bf16.gmra.mxu0 %v3508_v25  ;;  %2021 = vmatmul.mubr.bf16.gmra.mxu1 %v3508_v25 }
 0x328   : > { %1837 = vmatprep.mubr.bf16.mxu0 %v3161_v60  ;;  %2030 = vmatprep.mubr.bf16.mxu1 %v3161_v60 }
 0x329   : > { %v1365_v58 = vpop.f32.mrf.mxu0  ;;  %v1558_v19 = vpop.f32.mrf.mxu1 }
 0x32b   : > { %v1367_v44 = vpop.f32.mrf.mxu0  ;;  %v1560_v57 = vpop.f32.mrf.mxu1 }
 0x32c   : > { %v2101_v1 = vmax.f32 %v1363_v23, %v1367_v44  ;;  %v2163_v9 = vmax.f32 %v1556_v40, %v1560_v57 }
 0x32d   : > { %v1369_v12 = vpop.f32.mrf.mxu0  ;;  %v1562_v13 = vpop.f32.mrf.mxu1 }
 0x32e   : > { %v2132_v14 = vmax.f32 %v1365_v58, %v1369_v12  ;;  %v2194_v15 = vmax.f32 %v1558_v19, %v1562_v13 }
 0x32f   : > { %v1373_v16 = vpop.f32.mrf.mxu0  ;;  %v1566_v17 = vpop.f32.mrf.mxu1  ;;  %1838 = vmatmul.mubr.bf16.gmra.mxu0 %v3514_v33  ;;  %2031 = vmatmul.mubr.bf16.gmra.mxu1 %v3514_v33 }
 0x330   : > { %v2102_v18 = vmax.f32 %v2101_v1, %v1373_v16  ;;  %v2164_v20 = vmax.f32 %v2163_v9, %v1566_v17  ;;  %1847 = vmatprep.mubr.bf16.mxu0 %v3161_v60  ;;  %2040 = vmatprep.mubr.bf16.mxu1 %v3161_v60 }
 0x331   : > { %v1375_v21 = vpop.f32.mrf.mxu0  ;;  %v1568_v22 = vpop.f32.mrf.mxu1 }
 0x332   : > { %v2133_v24 = vmax.f32 %v2132_v14, %v1375_v21  ;;  %v2195_v25 = vmax.f32 %v2194_v15, %v1568_v22 }
 0x333   : > { %v1377_v26 = vpop.f32.mrf.mxu0  ;;  %v1570_v27 = vpop.f32.mrf.mxu1 }
 0x334   : > { %v2103_v30 = vmax.f32 %v2102_v18, %v1377_v26  ;;  %v2165_v32 = vmax.f32 %v2164_v20, %v1570_v27 }
 0x335   : > { %v1379_v35 = vpop.f32.mrf.mxu0  ;;  %v1572_v36 = vpop.f32.mrf.mxu1 }
 0x336   : > { %v2134_v37 = vmax.f32 %v2133_v24, %v1379_v35  ;;  %v2196_v29 = vmax.f32 %v2195_v25, %v1572_v36 }
 0x337   : > { %v1383_v38 = vpop.f32.mrf.mxu0  ;;  %v1576_v33 = vpop.f32.mrf.mxu1  ;;  %1848 = vmatmul.mubr.bf16.gmra.mxu0 %v3524_v34  ;;  %2041 = vmatmul.mubr.bf16.gmra.mxu1 %v3524_v34 }
 0x338   : > { %v2104_v39 = vmax.f32 %v2103_v30, %v1383_v38  ;;  %v2166_v28 = vmax.f32 %v2165_v32, %v1576_v33  ;;  %1857 = vmatprep.mubr.bf16.mxu0 %v3161_v60  ;;  %2050 = vmatprep.mubr.bf16.mxu1 %v3161_v60 }
 0x339   : > { %v1385_v31 = vpop.f32.mrf.mxu0  ;;  %v1578_v41 = vpop.f32.mrf.mxu1 }
 0x33a   : > { %v2135_v42 = vmax.f32 %v2134_v37, %v1385_v31  ;;  %v2197_v43 = vmax.f32 %v2196_v29, %v1578_v41 }
 0x33b   : > { %v1387_v45 = vpop.f32.mrf.mxu0  ;;  %v1580_v47 = vpop.f32.mrf.mxu1 }
 0x33c   : > { %v2105_v48 = vmax.f32 %v2104_v39, %v1387_v45  ;;  %v2167_v49 = vmax.f32 %v2166_v28, %v1580_v47 }
 0x33d   : > { %v1389_v50 = vpop.f32.mrf.mxu0  ;;  %v1582_v51 = vpop.f32.mrf.mxu1 }
 0x33e   : > { %v2136_v52 = vmax.f32 %v2135_v42, %v1389_v50  ;;  %v2198_v53 = vmax.f32 %v2197_v43, %v1582_v51 }
 0x33f   : > { %v1393_v54 = vpop.f32.mrf.mxu0  ;;  %v1586_v34 = vpop.f32.mrf.mxu1  ;;  %1858 = vmatmul.mubr.bf16.gmra.mxu0 %v3530_v46  ;;  %2051 = vmatmul.mubr.bf16.gmra.mxu1 %v3530_v46 }
 0x340   : > { %v2106_v56 = vmax.f32 %v2105_v48, %v1393_v54  ;;  %v2168_v59 = vmax.f32 %v2167_v49, %v1586_v34  ;;  %1867 = vmatprep.mubr.bf16.mxu0 %v3161_v60  ;;  %2060 = vmatprep.mubr.bf16.mxu1 %v3161_v60 }
 0x341   : > { %v1395_v61 = vpop.f32.mrf.mxu0  ;;  %v1588_v63 = vpop.f32.mrf.mxu1 }
 0x342   : > { %v2137_v62 = vmax.f32 %v2136_v52, %v1395_v61  ;;  %v2199_v2 = vmax.f32 %v2198_v53, %v1588_v63 }
 0x343   : > { %v1397_v3 = vpop.f32.mrf.mxu0  ;;  %v1590_v4 = vpop.f32.mrf.mxu1 }
 0x344   : > { %v2107_v5 = vmax.f32 %v2106_v56, %v1397_v3  ;;  %v2169_v6 = vmax.f32 %v2168_v59, %v1590_v4 }
 0x345   : > { %v1399_v8 = vpop.f32.mrf.mxu0  ;;  %v1592_v10 = vpop.f32.mrf.mxu1 }
 0x346   : > { %v2138_v23 = vmax.f32 %v2137_v62, %v1399_v8  ;;  %v2200_v40 = vmax.f32 %v2199_v2, %v1592_v10 }
 0x347   : > { %v1403_v58 = vpop.f32.mrf.mxu0  ;;  %v1596_v46 = vpop.f32.mrf.mxu1  ;;  %1868 = vmatmul.mubr.bf16.gmra.mxu0 %v3540_v55  ;;  %2061 = vmatmul.mubr.bf16.gmra.mxu1 %v3540_v55 }
 0x348   : > { %v2108_v19 = vmax.f32 %v2107_v5, %v1403_v58  ;;  %v2170_v44 = vmax.f32 %v2169_v6, %v1596_v46  ;;  %1877 = vmatprep.mubr.bf16.mxu0 %v3161_v60  ;;  %2070 = vmatprep.mubr.bf16.mxu1 %v3161_v60 }
 0x349   : > { %v1405_v57 = vpop.f32.mrf.mxu0  ;;  %v1598_v1 = vpop.f32.mrf.mxu1 }
 0x34a   : > { %v2139_v9 = vmax.f32 %v2138_v23, %v1405_v57  ;;  %v2201_v12 = vmax.f32 %v2200_v40, %v1598_v1 }
 0x34b   : > { %v1407_v13 = vpop.f32.mrf.mxu0  ;;  %v1600_v14 = vpop.f32.mrf.mxu1 }
 0x34c   : > { %v2109_v15 = vmax.f32 %v2108_v19, %v1407_v13  ;;  %v2171_v16 = vmax.f32 %v2170_v44, %v1600_v14 }
 0x34d   : > { %v1409_v17 = vpop.f32.mrf.mxu0  ;;  %v1602_v18 = vpop.f32.mrf.mxu1 }
 0x34e   : > { %v2140_v20 = vmax.f32 %v2139_v9, %v1409_v17  ;;  %v2202_v21 = vmax.f32 %v2201_v12, %v1602_v18 }
 0x34f   : > { %v1413_v22 = vpop.f32.mrf.mxu0  ;;  %v1606_v55 = vpop.f32.mrf.mxu1  ;;  %1878 = vmatmul.mubr.bf16.gmra.mxu0 %v3546_v0  ;;  %2071 = vmatmul.mubr.bf16.gmra.mxu1 %v3546_v0 }
 0x350   : > { %v2110_v24 = vmax.f32 %v2109_v15, %v1413_v22  ;;  %v2172_v25 = vmax.f32 %v2171_v16, %v1606_v55  ;;  %1887 = vmatprep.mubr.bf16.mxu0 %v3161_v60  ;;  %2080 = vmatprep.mubr.bf16.mxu1 %v3161_v60 }
 0x351   : > { %v1415_v26 = vpop.f32.mrf.mxu0  ;;  %v1608_v27 = vpop.f32.mrf.mxu1 }
 0x352   : > { %v2141_v30 = vmax.f32 %v2140_v20, %v1415_v26  ;;  %v2203_v32 = vmax.f32 %v2202_v21, %v1608_v27 }
 0x353   : > { %v1417_v35 = vpop.f32.mrf.mxu0  ;;  %v1610_v36 = vpop.f32.mrf.mxu1 }
 0x354   : > { %v2111_v37 = vmax.f32 %v2110_v24, %v1417_v35  ;;  %v2173_v29 = vmax.f32 %v2172_v25, %v1610_v36 }
 0x355   : > { %v1419_v38 = vpop.f32.mrf.mxu0  ;;  %v1612_v33 = vpop.f32.mrf.mxu1 }
 0x356   : > { %v2142_v39 = vmax.f32 %v2141_v30, %v1419_v38  ;;  %v2204_v28 = vmax.f32 %v2203_v32, %v1612_v33 }
 0x357   : > { %v1423_v31 = vpop.f32.mrf.mxu0  ;;  %v1616_v0 = vpop.f32.mrf.mxu1  ;;  %1888 = vmatmul.mubr.bf16.gmra.mxu0 %v3556_v7  ;;  %2081 = vmatmul.mubr.bf16.gmra.mxu1 %v3556_v7 }
 0x358   : > { %v2112_v41 = vmax.f32 %v2111_v37, %v1423_v31  ;;  %v2174_v42 = vmax.f32 %v2173_v29, %v1616_v0  ;;  %1897 = vmatprep.mubr.bf16.mxu0 %v3161_v60  ;;  %2090 = vmatprep.mubr.bf16.mxu1 %v3161_v60 }
 0x359   : > { %v1425_v43 = vpop.f32.mrf.mxu0  ;;  %v1618_v45 = vpop.f32.mrf.mxu1 }
 0x35a   : > { %v2143_v47 = vmax.f32 %v2142_v39, %v1425_v43  ;;  %v2205_v48 = vmax.f32 %v2204_v28, %v1618_v45 }
 0x35b   : > { %v1427_v49 = vpop.f32.mrf.mxu0  ;;  %v1620_v50 = vpop.f32.mrf.mxu1 }
 0x35c   : > { %v2113_v51 = vmax.f32 %v2112_v41, %v1427_v49  ;;  %v2175_v52 = vmax.f32 %v2174_v42, %v1620_v50 }
 0x35d   : > { %v1429_v53 = vpop.f32.mrf.mxu0  ;;  %v1622_v54 = vpop.f32.mrf.mxu1 }
 0x35e   : > { %v2144_v34 = vmax.f32 %v2143_v47, %v1429_v53  ;;  %v2206_v56 = vmax.f32 %v2205_v48, %v1622_v54 }
 0x35f   : > { %v1433_v59 = vpop.f32.mrf.mxu0  ;;  %v1626_v7 = vpop.f32.mrf.mxu1  ;;  %1898 = vmatmul.mubr.bf16.gmra.mxu0 %v3562_v11  ;;  %2091 = vmatmul.mubr.bf16.gmra.mxu1 %v3562_v11 }
 0x360   : > { %v2114_v61 = vmax.f32 %v2113_v51, %v1433_v59  ;;  %v2176_v60 = vmax.f32 %v2175_v52, %v1626_v7 }
 0x361   : > { %v1435_v63 = vpop.f32.mrf.mxu0  ;;  %v1628_v62 = vpop.f32.mrf.mxu1 }
 0x362   : > { %v2145_v2 = vmax.f32 %v2144_v34, %v1435_v63  ;;  %v2207_v3 = vmax.f32 %v2206_v56, %v1628_v62 }
 0x363   : > { %v1437_v4 = vpop.f32.mrf.mxu0  ;;  %v1630_v5 = vpop.f32.mrf.mxu1 }
 0x364   : > { %v2115_v6 = vmax.f32 %v2114_v61, %v1437_v4  ;;  %v2177_v8 = vmax.f32 %v2176_v60, %v1630_v5 }
 0x365   : > { %v1439_v10 = vpop.f32.mrf.mxu0  ;;  %v1632_v23 = vpop.f32.mrf.mxu1 }
 0x366   : > { %v2146_v40 = vmax.f32 %v2145_v2, %v1439_v10  ;;  %v2208_v58 = vmax.f32 %v2207_v3, %v1632_v23 }
 0x367   : > { %v1443_v46 = vpop.f32.mrf.mxu0  ;;  %v1636_v19 = vpop.f32.mrf.mxu1 }
 0x368   : > { %v2116_v44 = vmax.f32 %v2115_v6, %v1443_v46  ;;  %v2178_v57 = vmax.f32 %v2177_v8, %v1636_v19 }
 0x369   : > { %v1445_v1 = vpop.f32.mrf.mxu0  ;;  %v1638_v11 = vpop.f32.mrf.mxu1 }
 0x36a   : > { %v2147_v9 = vmax.f32 %v2146_v40, %v1445_v1  ;;  %v2209_v12 = vmax.f32 %v2208_v58, %v1638_v11 }
 0x36b   : > { %v1447_v13 = vpop.f32.mrf.mxu0  ;;  %v1640_v14 = vpop.f32.mrf.mxu1 }
 0x36c   : > { %v2117_v15 = vmax.f32 %v2116_v44, %v1447_v13  ;;  %v2179_v16 = vmax.f32 %v2178_v57, %v1640_v14 }
 0x36d   : > { %v1449_v17 = vpop.f32.mrf.mxu0  ;;  %v1642_v18 = vpop.f32.mrf.mxu1 }
 0x36e   : > { %v2148_v20 = vmax.f32 %v2147_v9, %v1449_v17  ;;  %v2210_v21 = vmax.f32 %v2209_v12, %v1642_v18 }
 0x36f   : > { %v1453_v22 = vpop.f32.mrf.mxu0  ;;  %v1646_v55 = vpop.f32.mrf.mxu1 }
 0x370   : > { %v2118_v24 = vmax.f32 %v2117_v15, %v1453_v22  ;;  %v2180_v25 = vmax.f32 %v2179_v16, %v1646_v55 }
 0x371   : > { %v1455_v26 = vpop.f32.mrf.mxu0  ;;  %v1648_v27 = vpop.f32.mrf.mxu1 }
 0x372   : > { %v2149_v30 = vmax.f32 %v2148_v20, %v1455_v26  ;;  %v2211_v32 = vmax.f32 %v2210_v21, %v1648_v27 }
 0x373   : > { %v1457_v35 = vpop.f32.mrf.mxu0  ;;  %v1650_v36 = vpop.f32.mrf.mxu1 }
 0x374   : > { %v2119_v37 = vmax.f32 %v2118_v24, %v1457_v35  ;;  %v2181_v29 = vmax.f32 %v2180_v25, %v1650_v36 }
 0x375   : > { %v1459_v38 = vpop.f32.mrf.mxu0  ;;  %v1652_v33 = vpop.f32.mrf.mxu1 }
 0x376   : > { %v2150_v39 = vmax.f32 %v2149_v30, %v1459_v38  ;;  %v2212_v28 = vmax.f32 %v2211_v32, %v1652_v33 }
 0x377   : > { %v1463_v31 = vpop.f32.mrf.mxu0  ;;  %v1656_v0 = vpop.f32.mrf.mxu1 }
 0x378   : > { %v2120_v41 = vmax.f32 %v2119_v37, %v1463_v31  ;;  %v2182_v42 = vmax.f32 %v2181_v29, %v1656_v0 }
 0x379   : > { %v1465_v43 = vpop.f32.mrf.mxu0  ;;  %v1658_v45 = vpop.f32.mrf.mxu1 }
 0x37a   : > { %v2151_v47 = vmax.f32 %v2150_v39, %v1465_v43  ;;  %v2213_v48 = vmax.f32 %v2212_v28, %v1658_v45 }
 0x37b   : > { %v1467_v49 = vpop.f32.mrf.mxu0  ;;  %v1660_v50 = vpop.f32.mrf.mxu1 }
 0x37c   : > { %v2121_v51 = vmax.f32 %v2120_v41, %v1467_v49  ;;  %v2183_v52 = vmax.f32 %v2182_v42, %v1660_v50 }
 0x37d   : > { %v1469_v53 = vpop.f32.mrf.mxu0  ;;  %v1662_v54 = vpop.f32.mrf.mxu1 }
 0x37e   : > { %v2152_v34 = vmax.f32 %v2151_v47, %v1469_v53  ;;  %v2214_v56 = vmax.f32 %v2213_v48, %v1662_v54 }
 0x37f   : > { %v1473_v59 = vpop.f32.mrf.mxu0  ;;  %v1666_v7 = vpop.f32.mrf.mxu1 }
 0x380   : > { %v2122_v61 = vmax.f32 %v2121_v51, %v1473_v59  ;;  %v2184_v60 = vmax.f32 %v2183_v52, %v1666_v7 }
 0x381   : > { %v1475_v63 = vpop.f32.mrf.mxu0  ;;  %v1668_v62 = vpop.f32.mrf.mxu1 }
 0x382   : > { %v2153_v2 = vmax.f32 %v2152_v34, %v1475_v63  ;;  %v2215_v3 = vmax.f32 %v2214_v56, %v1668_v62 }
 0x383   : > { %v1477_v4 = vpop.f32.mrf.mxu0  ;;  %v1670_v5 = vpop.f32.mrf.mxu1 }
 0x384   : > { %v2123_v6 = vmax.f32 %v2122_v61, %v1477_v4  ;;  %v2185_v8 = vmax.f32 %v2184_v60, %v1670_v5 }
 0x385   : > { %v1479_v10 = vpop.f32.mrf.mxu0  ;;  %v1672_v23 = vpop.f32.mrf.mxu1 }
 0x386   : > { %v2154_v40 = vmax.f32 %v2153_v2, %v1479_v10  ;;  %v2216_v58 = vmax.f32 %v2215_v3, %v1672_v23 }
 0x387   : > { %v1483_v46 = vpop.f32.mrf.mxu0  ;;  %v1676_v19 = vpop.f32.mrf.mxu1 }
 0x388   : > { %v2124_v44 = vmax.f32 %v2123_v6, %v1483_v46  ;;  %v2186_v57 = vmax.f32 %v2185_v8, %v1676_v19 }
 0x389   : > { %v1485_v1 = vpop.f32.mrf.mxu0  ;;  %v1678_v11 = vpop.f32.mrf.mxu1 }
 0x38a   : > { %v2155_v9 = vmax.f32 %v2154_v40, %v1485_v1  ;;  %v2217_v12 = vmax.f32 %v2216_v58, %v1678_v11 }
 0x38b   : > { %v1487_v13 = vpop.f32.mrf.mxu0  ;;  %v1680_v14 = vpop.f32.mrf.mxu1 }
 0x38c   : > { %v2125_v15 = vmax.f32 %v2124_v44, %v1487_v13  ;;  %v2187_v16 = vmax.f32 %v2186_v57, %v1680_v14  ;;  %v3162_v13 = vmov 1966171168  }
 0x38d   : > { %v1489_v17 = vpop.f32.mrf.mxu0  ;;  %v1682_v18 = vpop.f32.mrf.mxu1  ;;  %v2445_v14 = vunpack.c.l.s4 %v3162_v13 }
 0x38e   : > { %v2156_v20 = vmax.f32 %v2155_v9, %v1489_v17  ;;  %v2218_v21 = vmax.f32 %v2217_v12, %v1682_v18 }
 0x38f   : > { %v1493_v22 = vpop.f32.mrf.mxu0  ;;  %v1686_v55 = vpop.f32.mrf.mxu1 }
 0x390   : > { %v2126_v24 = vmax.f32 %v2125_v15, %v1493_v22  ;;  %v2188_v25 = vmax.f32 %v2187_v16, %v1686_v55  ;;  %v2447_v15 = vlaneseq }
 0x391   : > { %v1495_v26 = vpop.f32.mrf.mxu0  ;;  %v1688_v27 = vpop.f32.mrf.mxu1 }
 0x392   : > { %v2157_v30 = vmax.f32 %v2156_v20, %v1495_v26  ;;  %v2219_v32 = vmax.f32 %v2218_v21, %v1688_v27 }
 0x393   : > { %v1497_v35 = vpop.f32.mrf.mxu0  ;;  %v1690_v36 = vpop.f32.mrf.mxu1 }
 0x394   : > { %v2127_v37 = vmax.f32 %v2126_v24, %v1497_v35  ;;  %v2189_v29 = vmax.f32 %v2188_v25, %v1690_v36  ;;  %v2448_v35 = vshrl.u32 %v2447_v15, 7 }
 0x395   : > { %v1499_v38 = vpop.f32.mrf.mxu0  ;;  %v1692_v33 = vpop.f32.mrf.mxu1 }
 0x396   : > { %v2158_v39 = vmax.f32 %v2157_v30, %v1499_v38  ;;  %v2220_v28 = vmax.f32 %v2219_v32, %v1692_v33  ;;  %v2446_v32 = vunpack.c.0.s8 %v2445_v14 }
 0x397   : > { %v1503_v31 = vpop.f32.mrf.mxu0  ;;  %v1696_v0 = vpop.f32.mrf.mxu1 }
 0x398   : > { %v2128_v41 = vmax.f32 %v2127_v37, %v1503_v31  ;;  %v2190_v42 = vmax.f32 %v2189_v29, %v1696_v0 }
 0x399   : > { %v1505_v43 = vpop.f32.mrf.mxu0  ;;  %v1698_v45 = vpop.f32.mrf.mxu1 }
 0x39a   : > { %v2159_v47 = vmax.f32 %v2158_v39, %v1505_v43  ;;  %v2221_v48 = vmax.f32 %v2220_v28, %v1698_v45 }
 0x39b   : > { %v1507_v49 = vpop.f32.mrf.mxu0  ;;  %v1700_v50 = vpop.f32.mrf.mxu1 }
 0x39c   : > { %v2129_v51 = vmax.f32 %v2128_v41, %v1507_v49  ;;  %v2191_v52 = vmax.f32 %v2190_v42, %v1700_v50  ;;  %v3650_v42 = vsub.s32 %v2446_v32, %v2448_v35 }
 0x39d   : > { %v1509_v53 = vpop.f32.mrf.mxu0  ;;  %v1702_v54 = vpop.f32.mrf.mxu1 }
 0x39e   : > { %v2160_v34 = vmax.f32 %v2159_v47, %v1509_v53  ;;  %v2222_v56 = vmax.f32 %v2221_v48, %v1702_v54  ;;  %3984 = vst [vmem:[#allocation16_spill] sm:$0xff] %v3650_v42 }
 0x39f   : > { %v1513_v59 = vpop.f32.mrf.mxu0  ;;  %v1706_v7 = vpop.f32.mrf.mxu1 }
 0x3a0   : > { %v2130_v61 = vmax.f32 %v2129_v51, %v1513_v59  ;;  %v2192_v60 = vmax.f32 %v2191_v52, %v1706_v7 }
 0x3a1   : > { %v1515_v63 = vpop.f32.mrf.mxu0  ;;  %v1708_v62 = vpop.f32.mrf.mxu1 }
 0x3a2   : > { %v2161_v2 = vmax.f32 %v2160_v34, %v1515_v63  ;;  %v2223_v3 = vmax.f32 %v2222_v56, %v1708_v62 }
 0x3a3   : > { %v1517_v4 = vpop.f32.mrf.mxu0  ;;  %v1710_v5 = vpop.f32.mrf.mxu1 }
 0x3a4   : > { %v2131_v6 = vmax.f32 %v2130_v61, %v1517_v4  ;;  %v2193_v8 = vmax.f32 %v2192_v60, %v1710_v5 }
 0x3a5   : > { %v1519_v10 = vpop.f32.mrf.mxu0  ;;  %v1712_v23 = vpop.f32.mrf.mxu1 }
 0x3a6   : > { %v2384_v40 = vrot.slane %v2131_v6, 4  ;;  %v2396_v58 = vrot.slane %v2193_v8, 4  ;;  %v2162_v46 = vmax.f32 %v2161_v2, %v1519_v10  ;;  %v2224_v19 = vmax.f32 %v2223_v3, %v1712_v23 }
 0x3a7   : > { %v3630_v44 = vpop.f32.mrf.mxu0  ;;  %v3632_v57 = vpop.f32.mrf.mxu1 }
 0x3a8   : > { %v2385_v1 = vmax.f32 %v2131_v6, %v2384_v40  ;;  %v2397_v11 = vmax.f32 %v2193_v8, %v2396_v58  ;;  %v2390_v9 = vrot.slane %v2162_v46, 4  ;;  %v2402_v12 = vrot.slane %v2224_v19, 4 }
 0x3a9   : > { %v3634_v16 = vpop.f32.mrf.mxu0  ;;  %v3636_v17 = vpop.f32.mrf.mxu1 }
 0x3aa   : > { %v2386_v18 = vrot.slane %v2385_v1, 2  ;;  %v2398_v20 = vrot.slane %v2397_v11, 2  ;;  %v2391_v21 = vmax.f32 %v2162_v46, %v2390_v9  ;;  %v2403_v22 = vmax.f32 %v2224_v19, %v2402_v12 }
 0x3ab   : > { %v3638_v55 = vpop.f32.mrf.mxu0  ;;  %v3640_v24 = vpop.f32.mrf.mxu1 }
 0x3ac   : > { %v2387_v25 = vmax.f32 %v2385_v1, %v2386_v18  ;;  %v2399_v26 = vmax.f32 %v2397_v11, %v2398_v20  ;;  %v2392_v27 = vrot.slane %v2391_v21, 2  ;;  %v2404_v30 = vrot.slane %v2403_v22, 2 }
 0x3ad   : > { %v3642_v36 = vpop.f32.mrf.mxu0  ;;  %v3644_v37 = vpop.f32.mrf.mxu1 }
 0x3ae   : > { %v2388_v29 = vrot.slane %v2387_v25, 1  ;;  %v2400_v38 = vrot.slane %v2399_v26, 1  ;;  %v2393_v33 = vmax.f32 %v2391_v21, %v2392_v27  ;;  %v2405_v39 = vmax.f32 %v2403_v22, %v2404_v30 }
 0x3af   : > { %v3646_v28 = vpop.f32.mrf.mxu0  ;;  %v3648_v31 = vpop.f32.mrf.mxu1 }
 0x3b0   : > { %v2394_v0 = vrot.slane %v2393_v33, 1  ;;  %v2406_v41 = vrot.slane %v2405_v39, 1  ;;  %v2389_v47 = vmax.f32 %v2387_v25, %v2388_v29  ;;  %v2401_v48 = vmax.f32 %v2399_v26, %v2400_v38 }
 0x3b1   : > { %v3652_v43 = vpop.f32.mrf.mxu0  ;;  %v3654_v45 = vpop.f32.mrf.mxu1 }
 0x3b2   : > { %v2395_v49 = vmax.f32 %v2393_v33, %v2394_v0  ;;  %v2407_v50 = vmax.f32 %v2405_v39, %v2406_v41 }
 0x3b3   : > { %v3656_v51 = vpop.f32.mrf.mxu0  ;;  %v3658_v52 = vpop.f32.mrf.mxu1 }
 0x3b4   : > { %v2440_v53 = vcombine.low %v2389_v47, %v2395_v49  ;;  %v2441_v54 = vcombine.low %v2401_v48, %v2407_v50 }
 0x3b5   : > { %v3660_v34 = vpop.f32.mrf.mxu0  ;;  %v3662_v56 = vpop.f32.mrf.mxu1 }
 0x3b6   : > { %v3665_v59 = vrot.slane %v2440_v53, %v3650_v42  ;;  %v3668_v7 = vrot.slane %v2441_v54, %v3650_v42 }
 0x3b7   : > { %v3670_v61 = vpop.f32.mrf.mxu0  ;;  %v3672_v60 = vpop.f32.mrf.mxu1 }
 0x3b8   : > { %3985 = vst [vmem:[#allocation17_spill] sm:$0xff] %v3665_v59  ;;  %3986 = vst [vmem:[#allocation18_spill] sm:$0xff] %v3668_v7 }
 0x3b9   : > { %v3676_v62 = vpop.f32.mrf.mxu0  ;;  %v3678_v2 = vpop.f32.mrf.mxu1 }
 0x3bb   : > { %v3680_v3 = vpop.f32.mrf.mxu0  ;;  %v3682_v4 = vpop.f32.mrf.mxu1 }
 0x3bd   : > { %v3684_v5 = vpop.f32.mrf.mxu0  ;;  %v3686_v6 = vpop.f32.mrf.mxu1 }
 0x3bf   : > { %v3688_v8 = vpop.f32.mrf.mxu0  ;;  %v3690_v10 = vpop.f32.mrf.mxu1 }
 0x3c1   : > { %v3692_v23 = vpop.f32.mrf.mxu0  ;;  %v3694_v40 = vpop.f32.mrf.mxu1 }
 0x3c3   : > { %v3696_v58 = vpop.f32.mrf.mxu0  ;;  %v3698_v46 = vpop.f32.mrf.mxu1 }
 0x3c5   : > { %v3700_v19 = vpop.f32.mrf.mxu0  ;;  %v3702_v1 = vpop.f32.mrf.mxu1 }
 0x3c7   : > { %v3704_v11 = vpop.f32.mrf.mxu0  ;;  %v3706_v9 = vpop.f32.mrf.mxu1 }
 0x3c9   : > { %v3708_v12 = vpop.f32.mrf.mxu0  ;;  %v3710_v13 = vpop.f32.mrf.mxu1 }
 0x3cb   : > { %v3712_v14 = vpop.f32.mrf.mxu0  ;;  %v3714_v15 = vpop.f32.mrf.mxu1 }
 0x3cd   : > { %v3716_v18 = vpop.f32.mrf.mxu0  ;;  %v3718_v20 = vpop.f32.mrf.mxu1 }
 0x3cf   : > { %v3720_v21 = vpop.f32.mrf.mxu0  ;;  %v3722_v22 = vpop.f32.mrf.mxu1 }
 0x3d1   : > { %v3724_v25 = vpop.f32.mrf.mxu0  ;;  %v3726_v26 = vpop.f32.mrf.mxu1 }
 0x3d3   : > { %v3728_v27 = vpop.f32.mrf.mxu0  ;;  %v3730_v30 = vpop.f32.mrf.mxu1 }
 0x3d5   : > { %v3732_v32 = vpop.f32.mrf.mxu0  ;;  %v3734_v35 = vpop.f32.mrf.mxu1 }
 0x3d7   : > { %v3736_v29 = vpop.f32.mrf.mxu0  ;;  %v3738_v38 = vpop.f32.mrf.mxu1 }
 0x3d9   : > { %v3740_v33 = vpop.f32.mrf.mxu0  ;;  %v3742_v39 = vpop.f32.mrf.mxu1 }
 0x3db   : > { %v3744_v0 = vpop.f32.mrf.mxu0  ;;  %v3746_v41 = vpop.f32.mrf.mxu1 }
 0x3dc   : > { %3987 = vst [vmem:[#allocation19_spill] sm:$0xff] %v3746_v41 }
 0x3dd   : > { %v3748_v47 = vpop.f32.mrf.mxu0  ;;  %v3750_v48 = vpop.f32.mrf.mxu1 }
 0x3de   : > { %3988 = vst [vmem:[#allocation20_spill] sm:$0xff] %v3748_v47 }
 0x3df   : > { %v3752_v49 = vpop.f32.mrf.mxu0  ;;  %v3754_v50 = vpop.f32.mrf.mxu1 }
 0x3e0   : > { %3989 = vst [vmem:[#allocation21_spill] sm:$0xff] %v3752_v49  ;;  %3990 = vst [vmem:[#allocation22_spill] sm:$0xff] %v3754_v50  ;;  %v2225_v49 = vmax.f32 %v3630_v44, %v3638_v55 }
 0x3e1   : > { %v3756_v53 = vpop.f32.mrf.mxu0  ;;  %v3758_v54 = vpop.f32.mrf.mxu1 }
 0x3e2   : > { %3991 = vst [vmem:[#allocation23_spill] sm:$0xff] %v3756_v53  ;;  %3992 = vst [vmem:[#allocation24_spill] sm:$0xff] %v3758_v54  ;;  %v2287_v53 = vmax.f32 %v3632_v57, %v3640_v24 }
 0x3e3   : > { %v3760_v63 = vpop.f32.mrf.mxu0  ;;  %v3762_v7 = vpop.f32.mrf.mxu1 }
 0x3e4   : > { %3993 = vst [vmem:[#allocation25_spill] sm:$0xff] %v3762_v7  ;;  %v2256_v7 = vmax.f32 %v3634_v16, %v3642_v36 }
 0x3e5   : > { %v3764_v59 = vpop.f32.mrf.mxu0  ;;  %v3766_v42 = vpop.f32.mrf.mxu1 }
 0x3e6   : > { %3994 = vst [vmem:[#allocation26_spill] sm:$0xff] %v3764_v59  ;;  %3995 = vst [vmem:[#allocation27_spill] sm:$0xff] %v3766_v42  ;;  %v2318_v42 = vmax.f32 %v3636_v17, %v3644_v37  ;;  %v2257_v57 = vmax.f32 %v2256_v7, %v3652_v43 }
 0x3e7   : > { %v3768_v41 = vpop.f32.mrf.mxu0  ;;  %v3770_v47 = vpop.f32.mrf.mxu1 }
 0x3e8   : > { %3996 = vst [vmem:[#allocation28_spill] sm:$0xff] %v3768_v41  ;;  %3997 = vst [vmem:[#allocation29_spill] sm:$0xff] %v3770_v47  ;;  %v2226_v41 = vmax.f32 %v2225_v49, %v3646_v28  ;;  %v2288_v47 = vmax.f32 %v2287_v53, %v3648_v31  ;;  %v2319_v55 = vmax.f32 %v2318_v42, %v3654_v45 }
 0x3e9   : > { %v3776_v50 = vpop.f32.mrf.mxu0  ;;  %v3778_v54 = vpop.f32.mrf.mxu1  ;;  %v2258_v17 = vmax.f32 %v2257_v57, %v3660_v34 }
 0x3ea   : > { %3998 = vst [vmem:[#allocation30_spill] sm:$0xff] %v3778_v54  ;;  %v2227_v24 = vmax.f32 %v2226_v41, %v3656_v51  ;;  %v2289_v54 = vmax.f32 %v2288_v47, %v3658_v52  ;;  %v2320_v37 = vmax.f32 %v2319_v55, %v3662_v56 }
 0x3eb   : > { %v3786_v59 = vpop.f32.mrf.mxu0  ;;  %v3788_v44 = vpop.f32.mrf.mxu1  ;;  %v2259_v42 = vmax.f32 %v2258_v17, %v3676_v62 }
 0x3ec   : > { %v2228_v28 = vmax.f32 %v2227_v24, %v3670_v61  ;;  %v2290_v31 = vmax.f32 %v2289_v54, %v3672_v60  ;;  %v2321_v45 = vmax.f32 %v2320_v37, %v3678_v2 }
 0x3ed   : > { %v3794_v16 = vpop.f32.mrf.mxu0  ;;  %v3796_v36 = vpop.f32.mrf.mxu1  ;;  %v2260_v56 = vmax.f32 %v2259_v42, %v3684_v5 }
 0x3ee   : > { %v2229_v51 = vmax.f32 %v2228_v28, %v3680_v3  ;;  %v2291_v52 = vmax.f32 %v2290_v31, %v3682_v4  ;;  %v2322_v61 = vmax.f32 %v2321_v45, %v3686_v6 }
 0x3ef   : > { %v3802_v49 = vpop.f32.mrf.mxu0  ;;  %v3804_v43 = vpop.f32.mrf.mxu1  ;;  %v2261_v2 = vmax.f32 %v2260_v56, %v3692_v23 }
 0x3f0   : > { %v2230_v60 = vmax.f32 %v2229_v51, %v3688_v8  ;;  %v2292_v41 = vmax.f32 %v2291_v52, %v3690_v10  ;;  %v2323_v3 = vmax.f32 %v2322_v61, %v3694_v40  ;;  %v3999_v52 = vld [vmem:[#allocation19_spill] sm:$0xff] }
 0x3f1   : > { %v3810_v7 = vpop.f32.mrf.mxu0  ;;  %v3812_v34 = vpop.f32.mrf.mxu1  ;;  %v2262_v6 = vmax.f32 %v2261_v2, %v3700_v19  ;;  %v4001_v2 = vld [vmem:[#allocation21_spill] sm:$0xff] }
 0x3f2   : > { %v2231_v4 = vmax.f32 %v2230_v60, %v3696_v58  ;;  %v2293_v53 = vmax.f32 %v2292_v41, %v3698_v46  ;;  %v2324_v8 = vmax.f32 %v2323_v3, %v3702_v1  ;;  %v4000_v41 = vld [vmem:[#allocation20_spill] sm:$0xff]  ;;  %v4002_v3 = vld [vmem:[#allocation22_spill] sm:$0xff] }
 0x3f3   : > { %v3818_v47 = vpop.f32.mrf.mxu0  ;;  %v3820_v62 = vpop.f32.mrf.mxu1  ;;  %v2263_v40 = vmax.f32 %v2262_v6, %v3708_v12  ;;  %v4003_v6 = vld [vmem:[#allocation23_spill] sm:$0xff] }
 0x3f4   : > { %v2232_v10 = vmax.f32 %v2231_v4, %v3704_v11  ;;  %v2294_v57 = vmax.f32 %v2293_v53, %v3706_v9  ;;  %v2325_v58 = vmax.f32 %v2324_v8, %v3710_v13  ;;  %v4004_v8 = vld [vmem:[#allocation24_spill] sm:$0xff] }
 0x3f5   : > { %v3826_v54 = vpop.f32.mrf.mxu0  ;;  %v3828_v5 = vpop.f32.mrf.mxu1  ;;  %v2264_v1 = vmax.f32 %v2263_v40, %v3716_v18 }
 0x3f6   : > { %v2233_v46 = vmax.f32 %v2232_v10, %v3712_v14  ;;  %v2295_v24 = vmax.f32 %v2294_v57, %v3714_v15  ;;  %v2326_v11 = vmax.f32 %v2325_v58, %v3718_v20  ;;  %v4005_v10 = vld [vmem:[#allocation25_spill] sm:$0xff] }
 0x3f7   : > { %v3834_v55 = vpop.f32.mrf.mxu0  ;;  %v3836_v23 = vpop.f32.mrf.mxu1  ;;  %v2265_v13 = vmax.f32 %v2264_v1, %v3724_v25  ;;  %v4007_v1 = vld [vmem:[#allocation27_spill] sm:$0xff] }
 0x3f8   : > { %v2234_v9 = vmax.f32 %v2233_v46, %v3720_v21  ;;  %v2296_v37 = vmax.f32 %v2295_v24, %v3722_v22  ;;  %v2327_v14 = vmax.f32 %v2326_v11, %v3726_v26  ;;  %v4006_v46 = vld [vmem:[#allocation26_spill] sm:$0xff]  ;;  %v4008_v11 = vld [vmem:[#allocation28_spill] sm:$0xff] }
 0x3f9   : > { %v3842_v17 = vpop.f32.mrf.mxu0  ;;  %v3844_v19 = vpop.f32.mrf.mxu1  ;;  %v2266_v20 = vmax.f32 %v2265_v13, %v3732_v32 }
 0x3fa   : > { %v2235_v15 = vmax.f32 %v2234_v9, %v3728_v27  ;;  %v2297_v31 = vmax.f32 %v2296_v37, %v3730_v30  ;;  %v2328_v21 = vmax.f32 %v2327_v14, %v3734_v35  ;;  %v4009_v37 = vld [vmem:[#allocation29_spill] sm:$0xff] }
 0x3fb   : > { %v3850_v28 = vpop.f32.mrf.mxu0  ;;  %v3852_v12 = vpop.f32.mrf.mxu1  ;;  %v2267_v26 = vmax.f32 %v2266_v20, %v3740_v33  ;;  %v4010_v20 = vld [vmem:[#allocation30_spill] sm:$0xff] }
 0x3fc   : > { %v2236_v22 = vmax.f32 %v2235_v15, %v3736_v29  ;;  %v2298_v45 = vmax.f32 %v2297_v31, %v3738_v38  ;;  %v2329_v27 = vmax.f32 %v2328_v21, %v3742_v39 }
 0x3fd   : > { %v3858_v42 = vpop.f32.mrf.mxu0  ;;  %v3860_v18 = vpop.f32.mrf.mxu1  ;;  %v2268_v32 = vmax.f32 %v2267_v26, %v4000_v41 }
 0x3fe   : > { %v2237_v30 = vmax.f32 %v2236_v22, %v3744_v0  ;;  %v2299_v56 = vmax.f32 %v2298_v45, %v3999_v52  ;;  %v2330_v35 = vmax.f32 %v2329_v27, %v3750_v48 }
 0x3ff   : > { %v1859_v51 = vpop.f32.mrf.mxu0  ;;  %v2052_v25 = vpop.f32.mrf.mxu1  ;;  %v2269_v33 = vmax.f32 %v2268_v32, %v4003_v6 }
 0x400   : > { %v2238_v29 = vmax.f32 %v2237_v30, %v4001_v2  ;;  %v2300_v38 = vmax.f32 %v2299_v56, %v4002_v3  ;;  %v2331_v39 = vmax.f32 %v2330_v35, %v4004_v8 }
 0x401   : > { %v1861_v61 = vpop.f32.mrf.mxu0  ;;  %v2054_v60 = vpop.f32.mrf.mxu1  ;;  %v2270_v24 = vmax.f32 %v2269_v33, %v4006_v46 }
 0x402   : > { %v2239_v0 = vmax.f32 %v2238_v29, %v3760_v63  ;;  %v2301_v57 = vmax.f32 %v2300_v38, %v4005_v10  ;;  %v2332_v48 = vmax.f32 %v2331_v39, %v4007_v1 }
 0x403   : > { %v1863_v4 = vpop.f32.mrf.mxu0  ;;  %v2056_v53 = vpop.f32.mrf.mxu1  ;;  %v2271_v31 = vmax.f32 %v2270_v24, %v3776_v50 }
 0x404   : > { %v2240_v9 = vmax.f32 %v2239_v0, %v4008_v11  ;;  %v2302_v13 = vmax.f32 %v2301_v57, %v4009_v37  ;;  %v2333_v21 = vmax.f32 %v2332_v48, %v4010_v20 }
 0x405   : > { %v1865_v40 = vpop.f32.mrf.mxu0  ;;  %v2058_v58 = vpop.f32.mrf.mxu1  ;;  %v2272_v27 = vmax.f32 %v2271_v31, %v3794_v16 }
 0x406   : > { %v2241_v63 = vmax.f32 %v2240_v9, %v3786_v59  ;;  %v2303_v22 = vmax.f32 %v2302_v13, %v3788_v44  ;;  %v2334_v30 = vmax.f32 %v2333_v21, %v3796_v36 }
 0x407   : > { %v1869_v14 = vpop.f32.mrf.mxu0  ;;  %v2062_v15 = vpop.f32.mrf.mxu1  ;;  %v2273_v50 = vmax.f32 %v2272_v27, %v3810_v7 }
 0x408   : > { %v2242_v52 = vmax.f32 %v2241_v63, %v3802_v49  ;;  %v2304_v56 = vmax.f32 %v2303_v22, %v3804_v43  ;;  %v2335_v35 = vmax.f32 %v2334_v30, %v3812_v34 }
 0x409   : > { %v1871_v45 = vpop.f32.mrf.mxu0  ;;  %v2064_v26 = vpop.f32.mrf.mxu1  ;;  %v2274_v16 = vmax.f32 %v2273_v50, %v3826_v54 }
 0x40a   : > { %v2243_v59 = vmax.f32 %v2242_v52, %v3818_v47  ;;  %v2305_v44 = vmax.f32 %v2304_v56, %v3820_v62  ;;  %v2336_v36 = vmax.f32 %v2335_v35, %v3828_v5 }
 0x40b   : > { %v1873_v41 = vpop.f32.mrf.mxu0  ;;  %v2066_v32 = vpop.f32.mrf.mxu1  ;;  %v2275_v7 = vmax.f32 %v2274_v16, %v3842_v17 }
 0x40c   : > { %v2244_v49 = vmax.f32 %v2243_v59, %v3834_v55  ;;  %v2306_v43 = vmax.f32 %v2305_v44, %v3836_v23  ;;  %v2337_v34 = vmax.f32 %v2336_v36, %v3844_v19 }
 0x40d   : > { %v1875_v2 = vpop.f32.mrf.mxu0  ;;  %v2068_v29 = vpop.f32.mrf.mxu1  ;;  %v2276_v54 = vmax.f32 %v2275_v7, %v3858_v42 }
 0x40e   : > { %v2245_v47 = vmax.f32 %v2244_v49, %v3850_v28  ;;  %v2307_v62 = vmax.f32 %v2306_v43, %v3852_v12  ;;  %v2338_v5 = vmax.f32 %v2337_v34, %v3860_v18 }
 0x40f   : > { %v1879_v3 = vpop.f32.mrf.mxu0  ;;  %v2072_v38 = vpop.f32.mrf.mxu1  ;;  %v2277_v0 = vmax.f32 %v2276_v54, %v1861_v61 }
 0x410   : > { %v2246_v8 = vmax.f32 %v2245_v47, %v1859_v51  ;;  %v2308_v55 = vmax.f32 %v2307_v62, %v2052_v25  ;;  %v2339_v10 = vmax.f32 %v2338_v5, %v2054_v60 }
 0x411   : > { %v1881_v6 = vpop.f32.mrf.mxu0  ;;  %v2074_v33 = vpop.f32.mrf.mxu1  ;;  %v2278_v24 = vmax.f32 %v2277_v0, %v1865_v40 }
 0x412   : > { %v2247_v57 = vmax.f32 %v2246_v8, %v1863_v4  ;;  %v2309_v17 = vmax.f32 %v2308_v55, %v2056_v53  ;;  %v2340_v28 = vmax.f32 %v2339_v10, %v2058_v58 }
 0x413   : > { %v1883_v39 = vpop.f32.mrf.mxu0  ;;  %v2076_v23 = vpop.f32.mrf.mxu1  ;;  %v2279_v9 = vmax.f32 %v2278_v24, %v1871_v45 }
 0x414   : > { %v2248_v1 = vmax.f32 %v2247_v57, %v1869_v14  ;;  %v2310_v12 = vmax.f32 %v2309_v17, %v2062_v15  ;;  %v2341_v42 = vmax.f32 %v2340_v28, %v2064_v26 }
 0x415   : > { %v1885_v46 = vpop.f32.mrf.mxu0  ;;  %v2078_v19 = vpop.f32.mrf.mxu1  ;;  %v2280_v13 = vmax.f32 %v2279_v9, %v1875_v2 }
 0x416   : > { %v2249_v37 = vmax.f32 %v2248_v1, %v1873_v41  ;;  %v2311_v18 = vmax.f32 %v2310_v12, %v2066_v32  ;;  %v2342_v31 = vmax.f32 %v2341_v42, %v2068_v29 }
 0x417   : > { %v1889_v48 = vpop.f32.mrf.mxu0  ;;  %v2082_v11 = vpop.f32.mrf.mxu1  ;;  %v2281_v20 = vmax.f32 %v2280_v13, %v1881_v6  ;;  %v4011_v13 = vld [vmem:[#allocation16_spill] sm:$0xff] }
 0x418   : > { %v2250_v61 = vmax.f32 %v2249_v37, %v1879_v3  ;;  %v2312_v60 = vmax.f32 %v2311_v18, %v2072_v38  ;;  %v2343_v21 = vmax.f32 %v2342_v31, %v2074_v33 }
 0x419   : > { %v1891_v51 = vpop.f32.mrf.mxu0  ;;  %v2084_v25 = vpop.f32.mrf.mxu1  ;;  %v2282_v63 = vmax.f32 %v2281_v20, %v1885_v46 }
 0x41a   : > { %v2251_v40 = vmax.f32 %v2250_v61, %v1883_v39  ;;  %v2313_v58 = vmax.f32 %v2312_v60, %v2076_v23  ;;  %v2344_v22 = vmax.f32 %v2343_v21, %v2078_v19 }
 0x41b   : > { %v1893_v4 = vpop.f32.mrf.mxu0  ;;  %v2086_v53 = vpop.f32.mrf.mxu1  ;;  %v2283_v52 = vmax.f32 %v2282_v63, %v1891_v51 }
 0x41c   : > { %v2252_v45 = vmax.f32 %v2251_v40, %v1889_v48  ;;  %v2314_v26 = vmax.f32 %v2313_v58, %v2082_v11  ;;  %v2345_v56 = vmax.f32 %v2344_v22, %v2084_v25 }
 0x41d   : > { %v1895_v14 = vpop.f32.mrf.mxu0  ;;  %v2088_v15 = vpop.f32.mrf.mxu1 }
 0x41e   : > { %v2253_v41 = vmax.f32 %v2252_v45, %v1893_v4  ;;  %v2315_v32 = vmax.f32 %v2314_v26, %v2086_v53  ;;  %v2284_v59 = vmax.f32 %v2283_v52, %v1895_v14  ;;  %v2346_v44 = vmax.f32 %v2345_v56, %v2088_v15  ;;  %v4012_v4 = vld [vmem:[#allocation17_spill] sm:$0xff]  ;;  %v4013_v53 = vld [vmem:[#allocation18_spill] sm:$0xff] }
 0x41f   : > { %v1899_v27 = vpop.f32.mrf.mxu0  ;;  %v2092_v30 = vpop.f32.mrf.mxu1  ;;  %v4014_v20 = vcombine.low %v4012_v4, %v4013_v53 }
 0x420   : > { %v2254_v2 = vmax.f32 %v2253_v41, %v1899_v27  ;;  %v2316_v29 = vmax.f32 %v2315_v32, %v2092_v30 }
 0x421   : > { %v1901_v50 = vpop.f32.mrf.mxu0  ;;  %v2094_v35 = vpop.f32.mrf.mxu1  ;;  %v2480_v21 = vrot.slane %v4014_v20, %v4011_v13 }
 0x422   : > { %v2285_v49 = vmax.f32 %v2284_v59, %v1901_v50  ;;  %v2347_v43 = vmax.f32 %v2346_v44, %v2094_v35 }
 0x423   : > { %v1903_v16 = vpop.f32.mrf.mxu0  ;;  %v2096_v36 = vpop.f32.mrf.mxu1 }
 0x424   : > { %v2255_v3 = vmax.f32 %v2254_v2, %v1903_v16  ;;  %v2317_v38 = vmax.f32 %v2316_v29, %v2096_v36 }
 0x425   : > { %v1905_v7 = vpop.f32.mrf.mxu0  ;;  %v2098_v34 = vpop.f32.mrf.mxu1 }
 0x426   : > { %v2408_v47 = vrot.slane %v2255_v3, 4  ;;  %v2420_v62 = vrot.slane %v2317_v38, 4  ;;  %v2286_v6 = vmax.f32 %v2285_v49, %v1905_v7  ;;  %v2348_v33 = vmax.f32 %v2347_v43, %v2098_v34 }
 0x428   : > { %v2409_v54 = vmax.f32 %v2255_v3, %v2408_v47  ;;  %v2421_v5 = vmax.f32 %v2317_v38, %v2420_v62  ;;  %v2414_v8 = vrot.slane %v2286_v6, 4  ;;  %v2426_v55 = vrot.slane %v2348_v33, 4 }
 0x42a   : > { %v2410_v39 = vrot.slane %v2409_v54, 2  ;;  %v2422_v23 = vrot.slane %v2421_v5, 2  ;;  %v2415_v0 = vmax.f32 %v2286_v6, %v2414_v8  ;;  %v2427_v10 = vmax.f32 %v2348_v33, %v2426_v55 }
 0x42c   : > { %v2411_v57 = vmax.f32 %v2409_v54, %v2410_v39  ;;  %v2423_v17 = vmax.f32 %v2421_v5, %v2422_v23  ;;  %v2416_v46 = vrot.slane %v2415_v0, 2  ;;  %v2428_v19 = vrot.slane %v2427_v10, 2 }
 0x42e   : > { %v2412_v24 = vrot.slane %v2411_v57, 1  ;;  %v2424_v28 = vrot.slane %v2423_v17, 1  ;;  %v2417_v1 = vmax.f32 %v2415_v0, %v2416_v46  ;;  %v2429_v12 = vmax.f32 %v2427_v10, %v2428_v19 }
 0x430   : > { %v2418_v48 = vrot.slane %v2417_v1, 1  ;;  %v2430_v11 = vrot.slane %v2429_v12, 1  ;;  %v2413_v9 = vmax.f32 %v2411_v57, %v2412_v24  ;;  %v2425_v42 = vmax.f32 %v2423_v17, %v2424_v28 }
 0x432   : > { %v2419_v37 = vmax.f32 %v2417_v1, %v2418_v48  ;;  %v2431_v18 = vmax.f32 %v2429_v12, %v2430_v11 }
 0x434   : > { %v2442_v51 = vcombine.low %v2413_v9, %v2419_v37  ;;  %v2443_v25 = vcombine.low %v2425_v42, %v2431_v18 }
 0x436   : > { %v2464_v31 = vrot.slane %v2442_v51, %v4011_v13  ;;  %v2471_v61 = vrot.slane %v2443_v25, %v4011_v13 }
 0x438   : > { %v2473_v60 = vcombine.low %v2464_v31, %v2471_v61 }
 0x43a   : > { %v2487_v40 = vrot.slane %v2473_v60, %v4011_v13 }
 0x43c   : > { %v2488_v58 = vcombine.low %v2480_v21, %v2487_v40 }
 0x43e   : > { %2490 = vst [vmem:[%s325_s30] sm:$0xff] %v2488_v58 }
 0x43f   : > { %3076 = shalt.err (!%p3073_p2)
}
 0x440   : > { %s3077_s3 = scalar_lea.hbm %s2504_s28, 128  ;;  %s3081_s29 = scalar_lea.hbm %s3959_s6, 256 }
 0x441   : > { %p3078_p8 = scmp.ne.s32.totalorder %s2504_s28, %s3077_s3  ;;  %p3082_p10 = scmp.lt.s32.totalorder %s2504_s28, %s3959_s6 }
 0x442   : > { %p3083_p0 = scmp.lt.s32.totalorder %s3081_s29, %s3077_s3 }
 0x443   : > { %p3079_p12 = pnand %p3078_p8, %p3299_p13 }
 0x444   : > { %p3084_p9 = por %p3083_p0, %p3082_p10 }
 0x445   : > { %p3080_p7 = pneg %p3079_p12 }
 0x447   : > { %p3085_p1 = pnand %p3084_p9, %p3080_p7 }
 0x449   : > { %3088 = shalt.err (!%p3085_p1)
}
 0x44a   : > { %2867 = dma.vmem_to_hbm [thread:$0]  (%p3299_p13), %s2507_s13, 128, %s2504_s28, %s2492_s19  }
 0x44b PF: > { %s2518_s15 = sand.u32 1, %s3131_s21   ;;  %p4015_p11 = scmp.ne.s32.totalorder %s3973_s8, 0 }
 0x44c   : > { %p4016_p6 = scmp.ge.s32.totalorder %s3151_s26, 2  ;;  %s2519_s30 = scalar_lea.sflag [#allocation5], %s2518_s15 }
 0x44e   : > { %p2884_p3 = pnand %p4016_p6, %p4015_p11 }
 0x450   : > { %p2885_p5 = pneg %p2884_p3 }
 0x452   : > { %3126 = dma.done.wait (%p2885_p5), %s2519_s30, 128  }
 0x453   : > { %3128 = vsyncadd (%p2885_p5), %s2519_s30, 4294967168  ;;  %s24_s26 = sadd.s32 1, %s3151_s26   ;;  %s4017_s21 = smov %s3135_s22 }
 0x454   : > { %p21_p4 = scmp.ge.s32.totalorder %s24_s26, 4   ;;  %s4018_s22 = smov %s3139_s23 }
 0x455   : > { %s4019_s23 = smov %s3311_s12  ;;  %s4020_s24 = smov %s3147_s25 }
 0x456   : > { %s4021_s25 = smov %s4023_s20  ;;  %23 = sbr.rel (!%p21_p4) target bundleno = 11 (0xb), region = 109 }
 0x45b   :  { %2524 = vsyncpa [#allocation4], 1 }
 0x45c   :  { %2526 = vsyncpa [#allocation4 + $0x1], 1 }
 0x45d   :  { %2527 = vsyncpa [#allocation7], 1 }
 0x45e   :  { %2528 = vsyncpa [#allocation10], 1 }
 0x45f   :  { %2529 = vsyncpa [#allocation5], 1 }
 0x460   :  { %2531 = vsyncpa [#allocation5 + $0x1], 1 }

</bundles_post_ra>
